<compile_context>
chip_gen: v7x
topology: tpu7x:2x2x1
jax: 0.10.0
libtpu: 0.0.40
codegen_flags: <defaults>
</compile_context>

<pallas_src>
import functools

import jax
import jax.numpy as jnp
from jax.experimental import pallas as pl
from jax.experimental.pallas import tpu as pltpu


def _rotate_half(x):
    d = x.shape[-1]
    x1, x2 = x[..., : d // 2], x[..., d // 2:]
    return jnp.concatenate([-x2, x1], axis=-1)


def window_attention_kernel(x_ref, wqkv_ref, bqkv_ref, cos_ref, sin_ref,
                            wproj_ref, bproj_ref, o_ref,
                            *, num_heads, head_dim, seg):
    bt, L, C = x_ref.shape
    rows = bt * L

    # ---- fused qkv projection (+ pre-permuted rotate-half columns): one fat-M bf16 MXU pass
    # column segments (each padded to `seg` lanes): [scale*q | k | v | scale*rot(q) | rot(k)]
    x2 = x_ref[...].reshape(rows, C)                                     # bf16
    qkv = jnp.dot(x2, wqkv_ref[...],
                  preferred_element_type=jnp.float32) + bqkv_ref[...]    # (rows, 5*seg) f32

    def seg_slice(i):
        # vreg-aligned lane slice of segment i, back to (bt, L, C)
        return qkv[:, i * seg:i * seg + C].reshape(bt, L, C)

    cos = cos_ref[...]          # (L, C) f32, per-head tiled; broadcast over bt below
    sin = sin_ref[...]          # (L, C) f32, rotate-half sign folded in

    # RoPE: full-width f32 elementwise multiply-adds, zero in-kernel lane shuffles.
    q3 = (seg_slice(0) * cos + seg_slice(3) * sin).astype(jnp.bfloat16)  # scale already folded in
    k3 = (seg_slice(1) * cos + seg_slice(4) * sin).astype(jnp.bfloat16)
    v3 = seg_slice(2).astype(jnp.bfloat16)

    # ---- attention: one MXU issue per head per phase, batched over the Bt axis ----
    # TODO(synk): fold both batch axes (Bt, heads) into a single dot_general per phase if a
    # bundle dump shows MXU drain bubbles between the per-head matmuls.
    parts = []
    for h in range(num_heads):                                           # static, small
        sl = slice(h * head_dim, (h + 1) * head_dim)
        qh, kh, vh = q3[:, :, sl], k3[:, :, sl], v3[:, :, sl]
        s = jnp.einsum('bld,bmd->blm', qh, kh,
                       preferred_element_type=jnp.float32)               # (bt, L, L) f32
        s = s - jnp.max(s, axis=-1, keepdims=True)
        p = jnp.exp(s)
        # Deferred softmax normalization on the narrow (L, d) output; approx recip -> EUP slot.
        inv = pl.reciprocal(jnp.sum(p, axis=-1, keepdims=True), approx=True)
        oh = jnp.einsum('blm,bmd->bld', p.astype(jnp.bfloat16), vh,
                        preferred_element_type=jnp.float32)
        parts.append(oh * inv)

    # Head concat in registers (lane-dense, no scratch round trip) -> output projection.
    attn_out = jnp.concatenate(parts, axis=-1).reshape(rows, C)
    y = jnp.dot(attn_out.astype(jnp.bfloat16), wproj_ref[...],
                preferred_element_type=jnp.float32) + bproj_ref[...]
    o_ref[...] = y.reshape(bt, L, C).astype(o_ref.dtype)


def _round_up(n, m):
    return ((n + m - 1) // m) * m


def _vmem_limit_bytes():
    """Per-generation VMEM cap: ~3/4 of physical (v5e/v6e: 128 MiB -> 96 MiB,
    v7x: 64 MiB -> 48 MiB); safe fallback if the query is unavailable."""
    cap = 64 * 1024 * 1024
    try:
        info = pltpu.get_tpu_info()
        cap = int(getattr(info, "vmem_capacity_bytes", cap))
    except Exception:
        pass
    return int(min((cap * 3) // 4, 96 * 1024 * 1024))


def _pick_block_batch(B, L, bytes_per_row, vmem_budget, *, min_steps=4, max_rows=4096):
    """Largest divisor Bt of B whose block fits the VMEM budget ('biggest tile that fits');
    back off (by at most 4x) to expose >= min_steps grid steps so v7x's two TensorCores
    each see >= 2 pipelined steps."""
    divisors = [d for d in range(1, B + 1) if B % d == 0]
    fitting = [d for d in divisors
               if d * L <= max_rows and d * L * bytes_per_row <= vmem_budget] or [1]
    bt = max(fitting)
    if B // bt < min_steps:
        smaller = [d for d in fitting if B // d >= min_steps and 4 * d >= bt]
        if smaller:
            bt = max(smaller)
    return bt


def _resident_spec(shape):
    """BlockSpec for a grid-invariant operand: constant index_map, single-buffered."""
    index_map = lambda i, _shape=shape: (0,) * len(_shape)
    try:
        return pl.BlockSpec(shape, index_map, pipeline_mode=pl.Buffered(1))
    except Exception:  # older jax without pipeline_mode / Buffered
        return pl.BlockSpec(shape, index_map)


def window_attention(x, wqkv, bqkv, cos, sin, wproj, bproj, *, num_heads):
    B, L, C = x.shape
    head_dim = C // num_heads
    scale = head_dim ** (-0.5)
    out_dtype = x.dtype

    # TODO(synk): if the production window length L is not a multiple of 8 (e.g. 7x7=49),
    # pad L in the wrapper (masking padded keys out of the softmax) before blocking.

    # ---- one-time wrapper-side weight / table preparation (outside the kernel) ----
    # rotate-half as a column permutation: rot(x @ Wq + bq) = x @ Wq[:, perm] + bq[:, perm]
    cols = jnp.arange(C)
    perm = (cols // head_dim) * head_dim + (cols % head_dim + head_dim // 2) % head_dim

    wq, wk, wv = wqkv[:, :C], wqkv[:, C:2 * C], wqkv[:, 2 * C:3 * C]
    bq, bk, bv = bqkv[:, :C], bqkv[:, C:2 * C], bqkv[:, 2 * C:3 * C]

    # Pad each fused column segment to a 128-lane multiple so in-kernel slices are
    # vreg-aligned (no-op when C % 128 == 0).
    seg = _round_up(C, 128)

    def pad_cols(a):
        return jnp.pad(a, ((0, 0), (0, seg - C)))

    # Attention scale folded into the q columns: scores = (scale*rope(q)) @ rope(k)^T.
    w_segments = [scale * wq, wk, wv, scale * wq[:, perm], wk[:, perm]]
    b_segments = [scale * bq, bk, bv, scale * bq[:, perm], bk[:, perm]]
    w_ext = jnp.concatenate([pad_cols(w) for w in w_segments], axis=1).astype(jnp.bfloat16)
    b_ext = jnp.concatenate([pad_cols(b) for b in b_segments], axis=1).astype(jnp.float32)

    # Per-head-tiled cos table and sign-folded sin table: (L, C); broadcast over the Bt
    # block inside the kernel (no Bt replication in HBM/VMEM).
    sgn = jnp.concatenate([-jnp.ones(head_dim // 2), jnp.ones(head_dim // 2)])
    cos_t = jnp.tile(cos, (1, num_heads)).astype(jnp.float32)                  # (L, C)
    sin_t = jnp.tile(sin * sgn[None, :], (1, num_heads)).astype(jnp.float32)   # (L, C)

    x_bf16 = x.astype(jnp.bfloat16)   # halve activation HBM/DMA bytes (v5e is mem-bound)
    wproj_bf16 = wproj.astype(jnp.bfloat16)
    bproj_f32 = bproj.astype(jnp.float32)

    # ---- VMEM budgeting and batch-block selection ----
    vmem_limit = _vmem_limit_bytes()
    out_bytes = jnp.dtype(out_dtype).itemsize
    resident = ((w_ext.size + wproj_bf16.size) * 2
                + (b_ext.size + bproj_f32.size + cos_t.size + sin_t.size) * 4)
    # rough per-block-row estimate: double-buffered x/out blocks + f32 in-kernel temporaries
    bytes_per_row = (4 * C                  # x block (bf16) x2 buffers
                     + 2 * out_bytes * C    # out block x2 buffers
                     + 4 * 5 * seg          # f32 qkv temporary
                     + 4 * 8 * C            # rope / attention / concat f32 temporaries
                     + 8 * L)               # per-head score / prob rows
    budget = max(vmem_limit - 2 * resident - (2 << 20), 1)
    bt = _pick_block_batch(B, L, bytes_per_row, budget)

    kernel = functools.partial(window_attention_kernel,
                               num_heads=num_heads, head_dim=head_dim, seg=seg)
    return pl.pallas_call(
        kernel,
        out_shape=jax.ShapeDtypeStruct((B, L, C), out_dtype),
        grid_spec=pltpu.PrefetchScalarGridSpec(
            num_scalar_prefetch=0,
            grid=(B // bt,),
            in_specs=[
                pl.BlockSpec((bt, L, C), lambda i: (i, 0, 0)),   # x (bf16), blocked over batch
                _resident_spec((C, 5 * seg)),                    # W_qkv (+ rot copies), bf16
                _resident_spec((1, 5 * seg)),                    # b_qkv (+ rot copies), f32
                _resident_spec((L, C)),                          # cos table, f32
                _resident_spec((L, C)),                          # signed sin table, f32
                _resident_spec((C, C)),                          # W_proj, bf16
                _resident_spec((1, C)),                          # b_proj, f32
            ],
            out_specs=pl.BlockSpec((bt, L, C), lambda i: (i, 0, 0)),
        ),
        compiler_params=pltpu.CompilerParams(
            dimension_semantics=("parallel",),
            vmem_limit_bytes=vmem_limit,
        ),
    )(x_bf16, w_ext, b_ext, cos_t, sin_t, wproj_bf16, bproj_f32)


def reference(x, wqkv, bqkv, cos, sin, wproj, bproj, *, num_heads):
    """Pure-JAX f32 reference mirroring the PyTorch forward."""
    B, L, C = x.shape
    d = C // num_heads
    qkv = x @ wqkv + bqkv                                                      # (B, L, 3C)
    qkv = qkv.reshape(B, L, 3, num_heads, d).transpose(2, 0, 3, 1, 4)          # (3, B, n, L, d)
    q, k, v = qkv[0], qkv[1], qkv[2]

    def rope(t):
        return t * cos + _rotate_half(t) * sin                                  # cos/sin (L, d)

    q, k = rope(q), rope(k)
    attn = (d ** (-0.5)) * jnp.einsum('bnld,bnmd->bnlm', q, k)
    attn = jax.nn.softmax(attn, axis=-1)
    out = jnp.einsum('bnlm,bnmd->bnld', attn, v)
    out = out.transpose(0, 2, 1, 3).reshape(B, L, C)
    return out @ wproj + bproj


if __name__ == "__main__":
    B, L, embed_dim, num_heads = 8, 16, 32, 4
    head_dim = embed_dim // num_heads

    key = jax.random.PRNGKey(0)
    kx, kwq, kbq, kwp, kbp = jax.random.split(key, 5)

    x = jax.random.normal(kx, (B, L, embed_dim), dtype=jnp.float32)

    # nn.Linear(embed_dim, 3*embed_dim): weight stored here transposed as (C, 3C).
    wqkv = 0.05 * jax.random.normal(kwq, (embed_dim, 3 * embed_dim), dtype=jnp.float32)
    bqkv = 0.05 * jax.random.normal(kbq, (1, 3 * embed_dim), dtype=jnp.float32)
    # nn.Linear(embed_dim, embed_dim): weight stored transposed as (C, C).
    wproj = 0.05 * jax.random.normal(kwp, (embed_dim, embed_dim), dtype=jnp.float32)
    bproj = 0.05 * jax.random.normal(kbp, (1, embed_dim), dtype=jnp.float32)

    # Deterministic rotary tables (rotate-half convention).
    # TODO(synk): `rope` is an external callable in the original forward; a standard RoPE is used here.
    pos = jnp.arange(L, dtype=jnp.float32)
    inv_freq = 1.0 / (10000.0 ** (jnp.arange(0, head_dim, 2, dtype=jnp.float32) / head_dim))
    freqs = pos[:, None] * inv_freq[None, :]                                   # (L, d/2)
    cos = jnp.concatenate([jnp.cos(freqs), jnp.cos(freqs)], axis=-1)           # (L, d)
    sin = jnp.concatenate([jnp.sin(freqs), jnp.sin(freqs)], axis=-1)           # (L, d)

    out = window_attention(x, wqkv, bqkv, cos, sin, wproj, bproj, num_heads=num_heads)
    out = jax.block_until_ready(out)

    ref = reference(x, wqkv, bqkv, cos, sin, wproj, bproj, num_heads=num_heads)
    assert out.shape == (B, L, embed_dim)
    max_err = float(jnp.max(jnp.abs(out - ref)))
    # bf16 MXU operands + approx reciprocal vs the f32 reference: loosened tolerance
    # (observed error is ~1e-3; a logic bug would be orders of magnitude larger).
    assert jnp.allclose(out, ref, atol=2e-2, rtol=2e-2), f"mismatch vs reference (max abs err {max_err})"

    print("KERNEL_OK")
</pallas_src>

<mosaic_0001>
module attributes {stable_mosaic.version = 11 : i64} {
  func.func @window_attention_kernel(%arg0: i32, %arg1: memref<2x16x32xbf16, #tpu.memory_space<vmem>>, %arg2: memref<32x640xbf16, #tpu.memory_space<vmem>>, %arg3: memref<1x640xf32, #tpu.memory_space<vmem>>, %arg4: memref<16x32xf32, #tpu.memory_space<vmem>>, %arg5: memref<16x32xf32, #tpu.memory_space<vmem>>, %arg6: memref<32x32xbf16, #tpu.memory_space<vmem>>, %arg7: memref<1x32xf32, #tpu.memory_space<vmem>>, %arg8: memref<2x16x32xf32, #tpu.memory_space<vmem>>) attributes {dimension_semantics = [#tpu.dimension_semantics<parallel>], iteration_bounds = array<i64: 4>, scalar_prefetch = 0 : i64, scratch_operands = 0 : i64, tpu.core_type = #tpu.core_type<tc>, window_params = [{transform_indices = @transform_0, window_bounds = array<i64: 2, 16, 32>}, {pipeline_mode = #tpu.pipeline_mode<synchronous>, transform_indices = @transform_1, window_bounds = array<i64: 32, 640>}, {pipeline_mode = #tpu.pipeline_mode<synchronous>, transform_indices = @transform_2, window_bounds = array<i64: 1, 640>}, {pipeline_mode = #tpu.pipeline_mode<synchronous>, transform_indices = @transform_3, window_bounds = array<i64: 16, 32>}, {pipeline_mode = #tpu.pipeline_mode<synchronous>, transform_indices = @transform_4, window_bounds = array<i64: 16, 32>}, {pipeline_mode = #tpu.pipeline_mode<synchronous>, transform_indices = @transform_5, window_bounds = array<i64: 32, 32>}, {pipeline_mode = #tpu.pipeline_mode<synchronous>, transform_indices = @transform_6, window_bounds = array<i64: 1, 32>}, {transform_indices = @transform_7, window_bounds = array<i64: 2, 16, 32>}]} {
    %c0 = arith.constant 0 : index
    %c0_0 = arith.constant 0 : index
    %c0_1 = arith.constant 0 : index
    %0 = vector.load %arg1[%c0, %c0_0, %c0_1] : memref<2x16x32xbf16, #tpu.memory_space<vmem>>, vector<2x16x32xbf16>
    %1 = vector.shape_cast %0 : vector<2x16x32xbf16> to vector<32x32xbf16>
    %c0_2 = arith.constant 0 : index
    %c0_3 = arith.constant 0 : index
    %2 = vector.load %arg2[%c0_2, %c0_3] : memref<32x640xbf16, #tpu.memory_space<vmem>>, vector<32x640xbf16>
    %cst = arith.constant dense<0.000000e+00> : vector<32x640xf32>
    %3 = tpu.matmul %1, %2, %cst {dimension_numbers = #tpu.dot_dimension_numbers<[1], [0], [0], [1], [0, 0, 1, 1], [], []>} : vector<32x32xbf16>, vector<32x640xbf16>, vector<32x640xf32> -> vector<32x640xf32>
    %c0_4 = arith.constant 0 : index
    %c0_5 = arith.constant 0 : index
    %4 = vector.load %arg3[%c0_4, %c0_5] : memref<1x640xf32, #tpu.memory_space<vmem>>, vector<1x640xf32>
    %5 = vector.broadcast %4 : vector<1x640xf32> to vector<32x640xf32>
    %6 = arith.addf %3, %5 : vector<32x640xf32>
    %c0_6 = arith.constant 0 : index
    %c0_7 = arith.constant 0 : index
    %7 = vector.load %arg4[%c0_6, %c0_7] : memref<16x32xf32, #tpu.memory_space<vmem>>, vector<16x32xf32>
    %c0_8 = arith.constant 0 : index
    %c0_9 = arith.constant 0 : index
    %8 = vector.load %arg5[%c0_8, %c0_9] : memref<16x32xf32, #tpu.memory_space<vmem>>, vector<16x32xf32>
    %9 = vector.extract_strided_slice %6 {offsets = [0, 0], sizes = [32, 32], strides = [1, 1]} : vector<32x640xf32> to vector<32x32xf32>
    %10 = vector.shape_cast %9 : vector<32x32xf32> to vector<2x16x32xf32>
    %11 = vector.shape_cast %7 : vector<16x32xf32> to vector<1x16x32xf32>
    %12 = vector.broadcast %11 : vector<1x16x32xf32> to vector<2x16x32xf32>
    %13 = arith.mulf %10, %12 : vector<2x16x32xf32>
    %14 = vector.extract_strided_slice %6 {offsets = [0, 384], sizes = [32, 32], strides = [1, 1]} : vector<32x640xf32> to vector<32x32xf32>
    %15 = vector.shape_cast %14 : vector<32x32xf32> to vector<2x16x32xf32>
    %16 = vector.shape_cast %8 : vector<16x32xf32> to vector<1x16x32xf32>
    %17 = vector.broadcast %16 : vector<1x16x32xf32> to vector<2x16x32xf32>
    %18 = arith.mulf %15, %17 : vector<2x16x32xf32>
    %19 = arith.addf %13, %18 : vector<2x16x32xf32>
    %20 = arith.truncf %19 : vector<2x16x32xf32> to vector<2x16x32xbf16>
    %21 = vector.extract_strided_slice %6 {offsets = [0, 128], sizes = [32, 32], strides = [1, 1]} : vector<32x640xf32> to vector<32x32xf32>
    %22 = vector.shape_cast %21 : vector<32x32xf32> to vector<2x16x32xf32>
    %23 = vector.shape_cast %7 : vector<16x32xf32> to vector<1x16x32xf32>
    %24 = vector.broadcast %23 : vector<1x16x32xf32> to vector<2x16x32xf32>
    %25 = arith.mulf %22, %24 : vector<2x16x32xf32>
    %26 = vector.extract_strided_slice %6 {offsets = [0, 512], sizes = [32, 32], strides = [1, 1]} : vector<32x640xf32> to vector<32x32xf32>
    %27 = vector.shape_cast %26 : vector<32x32xf32> to vector<2x16x32xf32>
    %28 = vector.shape_cast %8 : vector<16x32xf32> to vector<1x16x32xf32>
    %29 = vector.broadcast %28 : vector<1x16x32xf32> to vector<2x16x32xf32>
    %30 = arith.mulf %27, %29 : vector<2x16x32xf32>
    %31 = arith.addf %25, %30 : vector<2x16x32xf32>
    %32 = arith.truncf %31 : vector<2x16x32xf32> to vector<2x16x32xbf16>
    %33 = vector.extract_strided_slice %6 {offsets = [0, 256], sizes = [32, 32], strides = [1, 1]} : vector<32x640xf32> to vector<32x32xf32>
    %34 = vector.shape_cast %33 : vector<32x32xf32> to vector<2x16x32xf32>
    %35 = arith.truncf %34 : vector<2x16x32xf32> to vector<2x16x32xbf16>
    %36 = vector.extract_strided_slice %20 {offsets = [0, 0, 0], sizes = [2, 16, 8], strides = [1, 1, 1]} : vector<2x16x32xbf16> to vector<2x16x8xbf16>
    %37 = vector.extract_strided_slice %32 {offsets = [0, 0, 0], sizes = [2, 16, 8], strides = [1, 1, 1]} : vector<2x16x32xbf16> to vector<2x16x8xbf16>
    %38 = vector.extract_strided_slice %35 {offsets = [0, 0, 0], sizes = [2, 16, 8], strides = [1, 1, 1]} : vector<2x16x32xbf16> to vector<2x16x8xbf16>
    "tpu.trace_start"() <{level = 10 : i32, message = "bld,bmd->blm"}> : () -> ()
    %cst_10 = arith.constant dense<0.000000e+00> : vector<2x16x16xf32>
    %39 = tpu.matmul %36, %37, %cst_10 {dimension_numbers = #tpu.dot_dimension_numbers<[2], [2], [1], [1], [0, 0, 0, 1, 1, 1], [0], [0]>} : vector<2x16x8xbf16>, vector<2x16x8xbf16>, vector<2x16x16xf32> -> vector<2x16x16xf32>
    "tpu.trace_stop"() : () -> ()
    %cst_11 = arith.constant dense<0xFF800000> : vector<2x16xf32>
    %40 = vector.multi_reduction <maximumf>, %39, %cst_11 [2] : vector<2x16x16xf32> to vector<2x16xf32>
    %41 = vector.shape_cast %40 : vector<2x16xf32> to vector<2x16x1xf32>
    %42 = vector.broadcast %41 : vector<2x16x1xf32> to vector<2x16x16xf32>
    %43 = arith.subf %39, %42 : vector<2x16x16xf32>
    %44 = math.exp %43 : vector<2x16x16xf32>
    %cst_12 = arith.constant dense<0.000000e+00> : vector<2x16xf32>
    %45 = vector.multi_reduction <add>, %44, %cst_12 [2] : vector<2x16x16xf32> to vector<2x16xf32>
    %46 = vector.shape_cast %45 : vector<2x16xf32> to vector<2x16x1xf32>
    %47 = tpu.reciprocal %46 {approx = true} : vector<2x16x1xf32> -> vector<2x16x1xf32>
    %48 = arith.truncf %44 : vector<2x16x16xf32> to vector<2x16x16xbf16>
    "tpu.trace_start"() <{level = 10 : i32, message = "blm,bmd->bld"}> : () -> ()
    %cst_13 = arith.constant dense<0.000000e+00> : vector<2x16x8xf32>
    %49 = tpu.matmul %48, %38, %cst_13 {dimension_numbers = #tpu.dot_dimension_numbers<[2], [1], [1], [2], [0, 0, 0, 1, 1, 2], [0], [0]>} : vector<2x16x16xbf16>, vector<2x16x8xbf16>, vector<2x16x8xf32> -> vector<2x16x8xf32>
    "tpu.trace_stop"() : () -> ()
    %50 = vector.broadcast %47 : vector<2x16x1xf32> to vector<2x16x8xf32>
    %51 = arith.mulf %49, %50 : vector<2x16x8xf32>
    %52 = vector.extract_strided_slice %20 {offsets = [0, 0, 8], sizes = [2, 16, 8], strides = [1, 1, 1]} : vector<2x16x32xbf16> to vector<2x16x8xbf16>
    %53 = vector.extract_strided_slice %32 {offsets = [0, 0, 8], sizes = [2, 16, 8], strides = [1, 1, 1]} : vector<2x16x32xbf16> to vector<2x16x8xbf16>
    %54 = vector.extract_strided_slice %35 {offsets = [0, 0, 8], sizes = [2, 16, 8], strides = [1, 1, 1]} : vector<2x16x32xbf16> to vector<2x16x8xbf16>
    "tpu.trace_start"() <{level = 10 : i32, message = "bld,bmd->blm"}> : () -> ()
    %cst_14 = arith.constant dense<0.000000e+00> : vector<2x16x16xf32>
    %55 = tpu.matmul %52, %53, %cst_14 {dimension_numbers = #tpu.dot_dimension_numbers<[2], [2], [1], [1], [0, 0, 0, 1, 1, 1], [0], [0]>} : vector<2x16x8xbf16>, vector<2x16x8xbf16>, vector<2x16x16xf32> -> vector<2x16x16xf32>
    "tpu.trace_stop"() : () -> ()
    %cst_15 = arith.constant dense<0xFF800000> : vector<2x16xf32>
    %56 = vector.multi_reduction <maximumf>, %55, %cst_15 [2] : vector<2x16x16xf32> to vector<2x16xf32>
    %57 = vector.shape_cast %56 : vector<2x16xf32> to vector<2x16x1xf32>
    %58 = vector.broadcast %57 : vector<2x16x1xf32> to vector<2x16x16xf32>
    %59 = arith.subf %55, %58 : vector<2x16x16xf32>
    %60 = math.exp %59 : vector<2x16x16xf32>
    %cst_16 = arith.constant dense<0.000000e+00> : vector<2x16xf32>
    %61 = vector.multi_reduction <add>, %60, %cst_16 [2] : vector<2x16x16xf32> to vector<2x16xf32>
    %62 = vector.shape_cast %61 : vector<2x16xf32> to vector<2x16x1xf32>
    %63 = tpu.reciprocal %62 {approx = true} : vector<2x16x1xf32> -> vector<2x16x1xf32>
    %64 = arith.truncf %60 : vector<2x16x16xf32> to vector<2x16x16xbf16>
    "tpu.trace_start"() <{level = 10 : i32, message = "blm,bmd->bld"}> : () -> ()
    %cst_17 = arith.constant dense<0.000000e+00> : vector<2x16x8xf32>
    %65 = tpu.matmul %64, %54, %cst_17 {dimension_numbers = #tpu.dot_dimension_numbers<[2], [1], [1], [2], [0, 0, 0, 1, 1, 2], [0], [0]>} : vector<2x16x16xbf16>, vector<2x16x8xbf16>, vector<2x16x8xf32> -> vector<2x16x8xf32>
    "tpu.trace_stop"() : () -> ()
    %66 = vector.broadcast %63 : vector<2x16x1xf32> to vector<2x16x8xf32>
    %67 = arith.mulf %65, %66 : vector<2x16x8xf32>
    %68 = vector.extract_strided_slice %20 {offsets = [0, 0, 16], sizes = [2, 16, 8], strides = [1, 1, 1]} : vector<2x16x32xbf16> to vector<2x16x8xbf16>
    %69 = vector.extract_strided_slice %32 {offsets = [0, 0, 16], sizes = [2, 16, 8], strides = [1, 1, 1]} : vector<2x16x32xbf16> to vector<2x16x8xbf16>
    %70 = vector.extract_strided_slice %35 {offsets = [0, 0, 16], sizes = [2, 16, 8], strides = [1, 1, 1]} : vector<2x16x32xbf16> to vector<2x16x8xbf16>
    "tpu.trace_start"() <{level = 10 : i32, message = "bld,bmd->blm"}> : () -> ()
    %cst_18 = arith.constant dense<0.000000e+00> : vector<2x16x16xf32>
    %71 = tpu.matmul %68, %69, %cst_18 {dimension_numbers = #tpu.dot_dimension_numbers<[2], [2], [1], [1], [0, 0, 0, 1, 1, 1], [0], [0]>} : vector<2x16x8xbf16>, vector<2x16x8xbf16>, vector<2x16x16xf32> -> vector<2x16x16xf32>
    "tpu.trace_stop"() : () -> ()
    %cst_19 = arith.constant dense<0xFF800000> : vector<2x16xf32>
    %72 = vector.multi_reduction <maximumf>, %71, %cst_19 [2] : vector<2x16x16xf32> to vector<2x16xf32>
    %73 = vector.shape_cast %72 : vector<2x16xf32> to vector<2x16x1xf32>
    %74 = vector.broadcast %73 : vector<2x16x1xf32> to vector<2x16x16xf32>
    %75 = arith.subf %71, %74 : vector<2x16x16xf32>
    %76 = math.exp %75 : vector<2x16x16xf32>
    %cst_20 = arith.constant dense<0.000000e+00> : vector<2x16xf32>
    %77 = vector.multi_reduction <add>, %76, %cst_20 [2] : vector<2x16x16xf32> to vector<2x16xf32>
    %78 = vector.shape_cast %77 : vector<2x16xf32> to vector<2x16x1xf32>
    %79 = tpu.reciprocal %78 {approx = true} : vector<2x16x1xf32> -> vector<2x16x1xf32>
    %80 = arith.truncf %76 : vector<2x16x16xf32> to vector<2x16x16xbf16>
    "tpu.trace_start"() <{level = 10 : i32, message = "blm,bmd->bld"}> : () -> ()
    %cst_21 = arith.constant dense<0.000000e+00> : vector<2x16x8xf32>
    %81 = tpu.matmul %80, %70, %cst_21 {dimension_numbers = #tpu.dot_dimension_numbers<[2], [1], [1], [2], [0, 0, 0, 1, 1, 2], [0], [0]>} : vector<2x16x16xbf16>, vector<2x16x8xbf16>, vector<2x16x8xf32> -> vector<2x16x8xf32>
    "tpu.trace_stop"() : () -> ()
    %82 = vector.broadcast %79 : vector<2x16x1xf32> to vector<2x16x8xf32>
    %83 = arith.mulf %81, %82 : vector<2x16x8xf32>
    %84 = vector.extract_strided_slice %20 {offsets = [0, 0, 24], sizes = [2, 16, 8], strides = [1, 1, 1]} : vector<2x16x32xbf16> to vector<2x16x8xbf16>
    %85 = vector.extract_strided_slice %32 {offsets = [0, 0, 24], sizes = [2, 16, 8], strides = [1, 1, 1]} : vector<2x16x32xbf16> to vector<2x16x8xbf16>
    %86 = vector.extract_strided_slice %35 {offsets = [0, 0, 24], sizes = [2, 16, 8], strides = [1, 1, 1]} : vector<2x16x32xbf16> to vector<2x16x8xbf16>
    "tpu.trace_start"() <{level = 10 : i32, message = "bld,bmd->blm"}> : () -> ()
    %cst_22 = arith.constant dense<0.000000e+00> : vector<2x16x16xf32>
    %87 = tpu.matmul %84, %85, %cst_22 {dimension_numbers = #tpu.dot_dimension_numbers<[2], [2], [1], [1], [0, 0, 0, 1, 1, 1], [0], [0]>} : vector<2x16x8xbf16>, vector<2x16x8xbf16>, vector<2x16x16xf32> -> vector<2x16x16xf32>
    "tpu.trace_stop"() : () -> ()
    %cst_23 = arith.constant dense<0xFF800000> : vector<2x16xf32>
    %88 = vector.multi_reduction <maximumf>, %87, %cst_23 [2] : vector<2x16x16xf32> to vector<2x16xf32>
    %89 = vector.shape_cast %88 : vector<2x16xf32> to vector<2x16x1xf32>
    %90 = vector.broadcast %89 : vector<2x16x1xf32> to vector<2x16x16xf32>
    %91 = arith.subf %87, %90 : vector<2x16x16xf32>
    %92 = math.exp %91 : vector<2x16x16xf32>
    %cst_24 = arith.constant dense<0.000000e+00> : vector<2x16xf32>
    %93 = vector.multi_reduction <add>, %92, %cst_24 [2] : vector<2x16x16xf32> to vector<2x16xf32>
    %94 = vector.shape_cast %93 : vector<2x16xf32> to vector<2x16x1xf32>
    %95 = tpu.reciprocal %94 {approx = true} : vector<2x16x1xf32> -> vector<2x16x1xf32>
    %96 = arith.truncf %92 : vector<2x16x16xf32> to vector<2x16x16xbf16>
    "tpu.trace_start"() <{level = 10 : i32, message = "blm,bmd->bld"}> : () -> ()
    %cst_25 = arith.constant dense<0.000000e+00> : vector<2x16x8xf32>
    %97 = tpu.matmul %96, %86, %cst_25 {dimension_numbers = #tpu.dot_dimension_numbers<[2], [1], [1], [2], [0, 0, 0, 1, 1, 2], [0], [0]>} : vector<2x16x16xbf16>, vector<2x16x8xbf16>, vector<2x16x8xf32> -> vector<2x16x8xf32>
    "tpu.trace_stop"() : () -> ()
    %98 = vector.broadcast %95 : vector<2x16x1xf32> to vector<2x16x8xf32>
    %99 = arith.mulf %97, %98 : vector<2x16x8xf32>
    %100 = tpu.concatenate %51, %67, %83, %99 in 2 : vector<2x16x8xf32>, vector<2x16x8xf32>, vector<2x16x8xf32>, vector<2x16x8xf32> -> vector<2x16x32xf32>
    %101 = vector.shape_cast %100 : vector<2x16x32xf32> to vector<32x32xf32>
    %102 = arith.truncf %101 : vector<32x32xf32> to vector<32x32xbf16>
    %c0_26 = arith.constant 0 : index
    %c0_27 = arith.constant 0 : index
    %103 = vector.load %arg6[%c0_26, %c0_27] : memref<32x32xbf16, #tpu.memory_space<vmem>>, vector<32x32xbf16>
    %cst_28 = arith.constant dense<0.000000e+00> : vector<32x32xf32>
    %104 = tpu.matmul %102, %103, %cst_28 {dimension_numbers = #tpu.dot_dimension_numbers<[1], [0], [0], [1], [0, 0, 1, 1], [], []>} : vector<32x32xbf16>, vector<32x32xbf16>, vector<32x32xf32> -> vector<32x32xf32>
    %c0_29 = arith.constant 0 : index
    %c0_30 = arith.constant 0 : index
    %105 = vector.load %arg7[%c0_29, %c0_30] : memref<1x32xf32, #tpu.memory_space<vmem>>, vector<1x32xf32>
    %106 = vector.broadcast %105 : vector<1x32xf32> to vector<32x32xf32>
    %107 = arith.addf %104, %106 : vector<32x32xf32>
    %108 = vector.shape_cast %107 : vector<32x32xf32> to vector<2x16x32xf32>
    %c0_31 = arith.constant 0 : index
    %c0_32 = arith.constant 0 : index
    %c0_33 = arith.constant 0 : index
    %109 = vector.load %arg8[%c0_31, %c0_32, %c0_33] : memref<2x16x32xf32, #tpu.memory_space<vmem>>, vector<2x16x32xf32>
    tpu.vector_store %arg8[%c0_31, %c0_32, %c0_33], %108 {strides = array<i32>} : memref<2x16x32xf32, #tpu.memory_space<vmem>>, vector<2x16x32xf32>,
    return
  }
  func.func @transform_0(%arg0: i32) -> (i32, i32, i32) {
    %c0_i32 = arith.constant 0 : i32
    %c0_i32_0 = arith.constant 0 : i32
    %c0_i32_1 = arith.constant 0 : i32
    return %arg0, %c0_i32, %c0_i32_0 : i32, i32, i32
  }
  func.func @transform_1(%arg0: i32) -> (i32, i32) {
    %c0_i32 = arith.constant 0 : i32
    %c0_i32_0 = arith.constant 0 : i32
    %c0_i32_1 = arith.constant 0 : i32
    return %c0_i32, %c0_i32_0 : i32, i32
  }
  func.func @transform_2(%arg0: i32) -> (i32, i32) {
    %c0_i32 = arith.constant 0 : i32
    %c0_i32_0 = arith.constant 0 : i32
    %c0_i32_1 = arith.constant 0 : i32
    return %c0_i32, %c0_i32_0 : i32, i32
  }
  func.func @transform_3(%arg0: i32) -> (i32, i32) {
    %c0_i32 = arith.constant 0 : i32
    %c0_i32_0 = arith.constant 0 : i32
    %c0_i32_1 = arith.constant 0 : i32
    return %c0_i32, %c0_i32_0 : i32, i32
  }
  func.func @transform_4(%arg0: i32) -> (i32, i32) {
    %c0_i32 = arith.constant 0 : i32
    %c0_i32_0 = arith.constant 0 : i32
    %c0_i32_1 = arith.constant 0 : i32
    return %c0_i32, %c0_i32_0 : i32, i32
  }
  func.func @transform_5(%arg0: i32) -> (i32, i32) {
    %c0_i32 = arith.constant 0 : i32
    %c0_i32_0 = arith.constant 0 : i32
    %c0_i32_1 = arith.constant 0 : i32
    return %c0_i32, %c0_i32_0 : i32, i32
  }
  func.func @transform_6(%arg0: i32) -> (i32, i32) {
    %c0_i32 = arith.constant 0 : i32
    %c0_i32_0 = arith.constant 0 : i32
    %c0_i32_1 = arith.constant 0 : i32
    return %c0_i32, %c0_i32_0 : i32, i32
  }
  func.func @transform_7(%arg0: i32) -> (i32, i32, i32) {
    %c0_i32 = arith.constant 0 : i32
    %c0_i32_0 = arith.constant 0 : i32
    %c0_i32_1 = arith.constant 0 : i32
    return %arg0, %c0_i32, %c0_i32_0 : i32, i32, i32
  }
}

</mosaic_0001>

<bundles_post_ra>
// kernel: tpu_custom_call.1
= control target key start
LH: loop header
LB: loop body
LE: loop exit
PB: predicated region body
PF: predicated region fallthrough
CT: control target
= control target key end

     0   :  { %s3156_s0 = inlined_call_operand.hbm [shape: bf16[8,16,32], index: 0, kind: input, shape index: {}]   ;;  %s3157_s1 = inlined_call_operand.hbm [shape: bf16[32,640], index: 1, kind: input, shape index: {}]   ;;  %s3158_s2 = inlined_call_operand.hbm [shape: f32[1,640], index: 2, kind: input, shape index: {}]   ;;  %s3159_s3 = inlined_call_operand.hbm [shape: f32[16,32], index: 3, kind: input, shape index: {}]   ;;  %s3160_s4 = inlined_call_operand.hbm [shape: f32[16,32], index: 4, kind: input, shape index: {}]   ;;  %s3161_s5 = inlined_call_operand.vmem [shape: bf16[32,32], index: 5, kind: input, shape index: {}]   ;;  %s3162_s6 = inlined_call_operand.vmem [shape: f32[1,32], index: 6, kind: input, shape index: {}]   ;;  %s3163_s7 = inlined_call_operand.hbm [shape: f32[8,16,32], index: 7, kind: output, shape index: {}]  }
   0x1   :  { %3167 = sst [smem:[#allocation16_spill]] %s3157_s1 }
   0x2   :  { %12 = vsyncpa [#allocation3], 0 }
   0x3   :  { %14 = vsyncpa [#allocation3 + $0x1], 0 }
   0x4   :  { %15 = vsyncpa [#allocation6], 0 }
   0x5   :  { %16 = vsyncpa [#allocation9], 0 }
   0x6   :  { %17 = vsyncpa [#allocation4], 0 }
   0x7   :  { %19 = vsyncpa [#allocation4 + $0x1], 0  ;;  %s2605_s24 = smov 0   ;;  %s2607_s25 = smov 0  }
   0x8   :  { %s2609_s26 = smov 0   ;;  %s2611_s27 = smov 0  }
   0x9 LB: > { %s2626_s28 = sadd.s32 4294967295, %s2541_s27   ;;  %s1891_s29 = sadd.s32 4294967294, %s2541_s27   ;;  %s2541_s27 = sphi %s2611_s27, %s3187_s27   ;;  %s2537_s26 = sphi %s2609_s26, %s3186_s26   ;;  %s2533_s25 = sphi %s2607_s25, %s3185_s25   ;;  %s2529_s24 = sphi %s2605_s24, %s3184_s24  }
   0xa   : > { %p45_p0 = scmp.ne.s32.totalorder %s2533_s25, %s2529_s24  ;;  %p3164_p1 = scmp.eq.s32.totalorder %s2626_s28, 0 }
   0xb   : > { %p201_p3 = scmp.eq.s32.totalorder %s1891_s29, 3  ;;  %p1892_p5 = scmp.ge.s32.totalorder %s2541_s27, 1 }
   0xc   : > { %p2635_p4 = por %p3164_p1, %p45_p0  ;;  %p208_p7 = scmp.lt.s32.totalorder %s2541_s27, 5 }
   0xd   : > { %p2640_p6 = por %p201_p3, %p45_p0  ;;  %s2543_s10 = smov [#allocation5]  }
   0xe   : > { %s3168_s30 = scalar_select %p2635_p4, 1, 0 }
   0xf   : > { %s3169_s8 = scalar_select %p2640_p6, 1, 0 }
  0x10   : > { %p2645_p8 = pnand %p1892_p5, %p208_p7  ;;  %s220_s11 = sshll.u32 %s2543_s10, 4  ;;  %s221_s11 = int_to_ptr.vmem [resolvable:$true] %s220_s11 }
  0x11   : > { %s2544_s13 = smov [#allocation8]   ;;  %s3172_s1 = sld [smem:[#allocation16_spill]] }
  0x12   : > { %s3170_s9 = scalar_select %p2645_p8, 1, 0 }
  0x13   : > { %p2130_p9 = pneg %p2645_p8  ;;  %s244_s14 = sshll.u32 %s2544_s13, 4  ;;  %s2657_s14 = int_to_ptr.vmem [resolvable:$true] %s244_s14 }
  0x15   : > { %p2653_p10 = pnand %p2130_p9, %p3164_p1 }
  0x17   : > { %s2325_s17 = scalar_lea.hbm %s3172_s1, 1280  ;;  %p2667_p12 = pneg %p2653_p10 }
  0x18   : > { %p2326_p11 = scmp.ne.s32.totalorder %s3172_s1, %s2325_s17  ;;  %p2332_p3 = scmp.lt.u32.totalorder %s2325_s17, %s3172_s1 }
  0x1a   : > { %p2328_p13 = pnand %p2667_p12, %p2326_p11 }
  0x1c   : > { %p2329_p0 = pneg %p2328_p13 }
  0x1e   : > { %p2334_p5 = pnand %p2332_p3, %p2329_p0 }
  0x20   : > { %2337 = shalt.err (!%p2334_p5)
}
  0x21   : > { %s2338_s23 = scalar_lea.vmem %s221_s11, 1280  ;;  %p2346_p2 = scmp.lt.s32.totalorder %s221_s11, %s221_s11 }
  0x22   : > { %p2339_p7 = scmp.ne.s32.totalorder %s221_s11, %s2338_s23  ;;  %p2347_p6 = scmp.lt.s32.totalorder %s2338_s23, %s2338_s23 }
  0x24   : > { %p2341_p9 = pnand %p2339_p7, %p2667_p12  ;;  %p2348_p4 = por %p2347_p6, %p2346_p2 }
  0x26   : > { %p2342_p1 = pneg %p2341_p9 }
  0x28   : > { %p2349_p8 = pnand %p2348_p4, %p2342_p1 }
  0x2a   : > { %2352 = shalt.err (!%p2349_p8)
}
  0x2b   : > { %s2545_s29 = smov 320   ;;  %s2546_s10 = smov 20  }
  0x2c   : > { %2133 = dma.hbm_to_vmem [thread:$0]  (!%p2653_p10), %s3172_s1, 1280, %s221_s11, [#allocation6], %s2545_s29, %s2545_s29, %s2546_s10  }
  0x2d   : > { %s2353_s18 = scalar_lea.hbm %s3159_s3, 256 }
  0x2e   : > { %p2354_p11 = scmp.ne.s32.totalorder %s3159_s3, %s2353_s18  ;;  %p2360_p4 = scmp.lt.u32.totalorder %s2353_s18, %s3159_s3 }
  0x30   : > { %p2356_p1 = pnand %p2354_p11, %p2667_p12 }
  0x32   : > { %p2357_p2 = pneg %p2356_p1 }
  0x34   : > { %p2362_p6 = pnand %p2360_p4, %p2357_p2 }
  0x36   : > { %2365 = shalt.err (!%p2362_p6)
}
  0x37   : > { %s2366_s11 = scalar_lea.vmem %s2657_s14, 256  ;;  %p2374_p3 = scmp.lt.s32.totalorder %s2657_s14, %s2657_s14 }
  0x38   : > { %p2367_p8 = scmp.ne.s32.totalorder %s2657_s14, %s2366_s11  ;;  %p2375_p5 = scmp.lt.s32.totalorder %s2366_s11, %s2366_s11 }
  0x3a   : > { %p2369_p13 = pnand %p2367_p8, %p2667_p12  ;;  %p2376_p7 = por %p2375_p5, %p2374_p3 }
  0x3c   : > { %p2370_p0 = pneg %p2369_p13 }
  0x3e   : > { %p2377_p9 = pnand %p2376_p7, %p2370_p0 }
  0x40   : > { %2380 = shalt.err (!%p2377_p9)
}
  0x41   : > { %s2547_s29 = smov 128   ;;  %s2548_s10 = smov 8  }
  0x42   : > { %2139 = dma.hbm_to_vmem [thread:$0]  (!%p2653_p10), %s3159_s3, 256, %s2657_s14, [#allocation9], %s2547_s29, %s2547_s29, %s2548_s10  }
  0x43   : > { %s2549_s16 = smov [#allocation7]   ;;  %s2550_s18 = smov [#allocation10]  }
  0x44   : > { %s234_s17 = sshll.u32 %s2549_s16, 4  ;;  %s257_s19 = sshll.u32 %s2550_s18, 4  ;;  %s235_s17 = int_to_ptr.vmem [resolvable:$true] %s234_s17  ;;  %s2709_s19 = int_to_ptr.vmem [resolvable:$true] %s257_s19 }
  0x45   : > { %s2381_s23 = scalar_lea.hbm %s3158_s2, 80 }
  0x46   : > { %p2382_p11 = scmp.ne.s32.totalorder %s3158_s2, %s2381_s23  ;;  %p2388_p4 = scmp.lt.u32.totalorder %s2381_s23, %s3158_s2 }
  0x48   : > { %p2384_p1 = pnand %p2382_p11, %p2667_p12 }
  0x4a   : > { %p2385_p2 = pneg %p2384_p1 }
  0x4c   : > { %p2390_p6 = pnand %p2388_p4, %p2385_p2 }
  0x4e   : > { %2393 = shalt.err (!%p2390_p6)
}
  0x4f   : > { %s2394_s15 = scalar_lea.vmem %s235_s17, 80  ;;  %s2401_s16 = scalar_lea.vmem %s235_s17, 96 }
  0x50   : > { %p2395_p8 = scmp.ne.s32.totalorder %s235_s17, %s2394_s15  ;;  %p2402_p3 = scmp.lt.s32.totalorder %s235_s17, %s235_s17 }
  0x51   : > { %p2403_p5 = scmp.lt.s32.totalorder %s2401_s16, %s2394_s15 }
  0x52   : > { %p2397_p13 = pnand %p2395_p8, %p2667_p12 }
  0x53   : > { %p2404_p7 = por %p2403_p5, %p2402_p3 }
  0x54   : > { %p2398_p0 = pneg %p2397_p13 }
  0x56   : > { %p2405_p9 = pnand %p2404_p7, %p2398_p0 }
  0x58   : > { %2408 = shalt.err (!%p2405_p9)
}
  0x59   : > { %2136 = dma.hbm_to_vmem [thread:$0]  (!%p2653_p10), %s3158_s2, 80, %s235_s17, [#allocation6]  }
  0x5a   : > { %s2409_s23 = scalar_lea.hbm %s3160_s4, 256 }
  0x5b   : > { %p2410_p11 = scmp.ne.s32.totalorder %s3160_s4, %s2409_s23  ;;  %p2416_p4 = scmp.lt.u32.totalorder %s2409_s23, %s3160_s4 }
  0x5d   : > { %p2412_p1 = pnand %p2410_p11, %p2667_p12 }
  0x5f   : > { %p2413_p2 = pneg %p2412_p1 }
  0x61   : > { %p2418_p6 = pnand %p2416_p4, %p2413_p2 }
  0x63   : > { %2421 = shalt.err (!%p2418_p6)
}
  0x64   : > { %s2422_s17 = scalar_lea.vmem %s2709_s19, 256  ;;  %p2430_p3 = scmp.lt.s32.totalorder %s2709_s19, %s2709_s19 }
  0x65   : > { %p2423_p8 = scmp.ne.s32.totalorder %s2709_s19, %s2422_s17  ;;  %p2431_p5 = scmp.lt.s32.totalorder %s2422_s17, %s2422_s17 }
  0x67   : > { %p2425_p13 = pnand %p2423_p8, %p2667_p12  ;;  %p2432_p7 = por %p2431_p5, %p2430_p3 }
  0x69   : > { %p2426_p0 = pneg %p2425_p13 }
  0x6b   : > { %p2433_p9 = pnand %p2432_p7, %p2426_p0 }
  0x6d   : > { %2436 = shalt.err (!%p2433_p9)
}
  0x6e   : > { %2142 = dma.hbm_to_vmem [thread:$0]  (!%p2653_p10), %s3160_s4, 256, %s2709_s19, [#allocation9], %s2547_s29, %s2547_s29, %s2548_s10  }
  0x6f   : > { %s2756_s12 = sadd.s32 1, %s2541_s27   ;;  %s32_s18 = sadd.s32 1, %s2537_s26 }
  0x70   : > { %s29_s20 = ssub.s32 %s2541_s27, %s2756_s12  ;;  %p39_p11 = scmp.ne.s32.totalorder %s2537_s26, %s2533_s25 }
  0x71   : > { %p30_p12 = scmp.eq.s32.totalorder %s29_s20, 0  ;;  %p40_p1 = scmp.eq.s32.totalorder %s2541_s27, 0 }
  0x72   : > { %p3174_p4 = scmp.eq.s32.totalorder %s2626_s28, 3  ;;  %p2155_p8 = scmp.lt.s32.totalorder %s2541_s27, 4 }
  0x73   : > { %s2765_s21 = scalar_select %p30_p12, %s2537_s26, %s32_s18  }
  0x74   : > { %p41_p2 = por %p40_p1, %p39_p11  ;;  %p2769_p6 = por %p3174_p4, %p39_p11 }
  0x75   : > { %s277_s23 = sand.u32 1, %s2537_s26   ;;  %s1955_s29 = sshll.u32 %s2541_s27, 8 }
  0x76   : > { %s1898_s11 = sshll.u32 %s277_s23, 4  ;;  %s2779_s13 = scalar_lea.hbm %s3156_s0, %s1955_s29 }
  0x77   : > { %s281_s14 = scalar_lea.vmem [#allocation2], %s1898_s11  ;;  %p2783_p10 = pnand %p2155_p8, %p41_p2 }
  0x78   : > { %s289_s15 = sshll.u32 %s281_s14, 4  ;;  %s2787_s16 = scalar_lea.sflag [#allocation3], %s277_s23  ;;  %s2781_s15 = int_to_ptr.vmem [resolvable:$true] %s289_s15 }
  0x79   : > { %s2437_s1 = scalar_lea.hbm %s2779_s13, 256  ;;  %p2439_p0 = pneg %p2783_p10 }
  0x7a   : > { %p2438_p13 = scmp.ne.s32.totalorder %s2779_s13, %s2437_s1  ;;  %s2442_s11 = scalar_lea.hbm %s3156_s0, 1024 }
  0x7b   : > { %p2443_p7 = scmp.lt.u32.totalorder %s2779_s13, %s3156_s0  ;;  %p2444_p9 = scmp.lt.u32.totalorder %s2442_s11, %s2437_s1 }
  0x7c   : > { %p2440_p3 = pnand %p2439_p0, %p2438_p13  ;;  %p2446_p11 = scmp.lt.u32.totalorder %s2437_s1, %s2779_s13 }
  0x7d   : > { %p2445_p12 = por %p2444_p9, %p2443_p7 }
  0x7e   : > { %p2441_p5 = pneg %p2440_p3 }
  0x7f   : > { %p2447_p1 = por %p2446_p11, %p2445_p12 }
  0x81   : > { %p2448_p2 = pnand %p2447_p1, %p2441_p5 }
  0x83   : > { %2451 = shalt.err (!%p2448_p2)
}
  0x84   : > { %s2452_s23 = scalar_lea.vmem %s2781_s15, 256  ;;  %s2551_s19 = smov [#allocation2]  }
  0x85   : > { %p2453_p4 = scmp.ne.s32.totalorder %s2781_s15, %s2452_s23  ;;  %s2457_s14 = sshll.u32 %s2551_s19, 4  ;;  %s2458_s14 = int_to_ptr.vmem [resolvable:$false] %s2457_s14 }
  0x86   : > { %s2459_s20 = scalar_lea.vmem %s2458_s14, 512  ;;  %p2460_p3 = scmp.lt.s32.totalorder %s2781_s15, %s2458_s14 }
  0x87   : > { %p2455_p8 = pnand %p2453_p4, %p2439_p0  ;;  %p2461_p7 = scmp.lt.s32.totalorder %s2459_s20, %s2452_s23 }
  0x89   : > { %p2456_p13 = pneg %p2455_p8  ;;  %p2462_p9 = por %p2461_p7, %p2460_p3 }
  0x8b   : > { %p2463_p12 = pnand %p2462_p9, %p2456_p13 }
  0x8d   : > { %2466 = shalt.err (!%p2463_p12)
}
  0x8e   : > { %s2552_s1 = smov 64   ;;  %s2553_s18 = smov 4  }
  0x8f   : > { %2146 = dma.hbm_to_vmem [thread:$0]  (!%p2783_p10), %s2779_s13, 256, %s2781_s15, %s2787_s16, %s2552_s1, %s2552_s1, %s2553_s18  }
  0x90   : > { %p3177_p0 = scmp.ne.s32.totalorder %s3170_s9, 0 }
  0x91   : > { %s2818_s11 = sand.u32 (!%p3177_p0), 1, %s2533_s25   ;;  %p3178_p5 = scmp.ne.s32.totalorder (!%p3177_p0), %s3168_s30, 0 }
  0x92   : > { %301 = sbr.rel (%p3177_p0) target bundleno = 2526 (0x9de), region = 48  ;;  %s1903_s29 = sshll.u32 (!%p3177_p0), %s2818_s11, 4 }
  0x93   : > { %s304_s10 = scalar_lea.sflag (!%p3177_p0), [#allocation3], %s2818_s11  ;;  %s2822_s23 = scalar_lea.vmem (!%p3177_p0), [#allocation2], %s1903_s29 }
  0x99   : > { %2512 = dma.done.wait (%p3178_p5), %s304_s10, 256  }
  0x9a   : > { %2514 = vsyncadd (%p3178_p5), %s304_s10, 4294967040  ;;  %p3179_p10 = scmp.eq.s32.totalorder %s2626_s28, 0 }
  0x9c   : > { %2516 = dma.done.wait (%p3179_p10), [#allocation6], 1360   ;;  %p3180_p11 = pmov %p3179_p10 }
  0x9d   : > { %p3181_p1 = pmov %p3179_p10 }
  0x9e   : > { %2518 = vsyncadd (%p3180_p11), [#allocation6], 4294965936 }
  0x9f   : > { %2520 = dma.done.wait (%p3181_p1), [#allocation9], 512   ;;  %p3182_p2 = pmov %p3181_p1 }
  0xa0   : > { %v2554_v0 = vmov 0   ;;  %v2243_v1 = vld [vmem:[#allocation5 + $0x4] ss:$20 sps:$4 sm:$0xff]   ;;  %v2245_v2 = vld [vmem:[#allocation5 + $0xc] ss:$20 sps:$4 sm:$0xff]   ;;  %vm462_vm0 = vcmask 261120   ;;  %v375_v14 = vlaneseq }
  0xa1   : > { %2522 = vsyncadd (%p3182_p2), [#allocation9], 4294966784  ;;  %501 = vmatprep.mubr.bf16.mxu0 %v2554_v0  ;;  %554 = vmatprep.mubr.bf16.mxu1 %v2554_v0  ;;  %v2247_v3 = vld [vmem:[#allocation5] ss:$20 sps:$4 sm:$0xff]   ;;  %v2248_v4 = vld [vmem:[#allocation5 + $0x8] ss:$20 sps:$4 sm:$0xff]  }
  0xa2   : > { %469 = vmatprep.subr.bf16.mxu0 %v2243_v1  ;;  %522 = vmatprep.subr.bf16.mxu1 %v2245_v2  ;;  %v2249_v5 = vld [vmem:[#allocation5 + $0x2c] ss:$20 sps:$4 sm:$0xff]   ;;  %v2251_v6 = vld [vmem:[#allocation5 + $0x34] ss:$20 sps:$4 sm:$0xff]   ;;  %v2254_v8 = vld [vmem:[#allocation5 + $0x30] ss:$20 sps:$4 sm:$0xff]  }
  0xa3   : > { %470 = vmatpush1.bf16.msra.mxu0 %v2247_v3  ;;  %523 = vmatpush1.bf16.msra.mxu1 %v2248_v4  ;;  %v2253_v7 = vld [vmem:[#allocation5 + $0x28] ss:$20 sps:$4 sm:$0xff]   ;;  %v2255_v9 = vld [vmem:[%s2822_s23] sm:$0xff]   ;;  %v2258_v11 = vld [vmem:[#allocation5 + $0x38] ss:$20 sps:$4 sm:$0xff]   ;;  %v2555_v13 = vmov 0.0  }
  0xa4   : > { %471 = vmatprep.subr.bf16.mxu0 %v2249_v5  ;;  %524 = vmatprep.subr.bf16.mxu1 %v2251_v6  ;;  %v2256_v10 = vld [vmem:[#allocation5 + $0x10] ss:$20 sps:$4 sm:$0xff]   ;;  %v2257_v12 = vld [vmem:[%s2822_s23 + $0x8] sm:$0xff]   ;;  %vm2556_vm1 = vmmov 0   ;;  %v376_v15 = vshrl.u32 %v375_v14, 7  ;;  %vm658_vm2 = vcmask 64512  }
  0xa5   : > { %v373_v18 = vld [vmem:[#allocation7] sm:$0x1f]  ;;  %v2850_v24 = vld [vmem:[#allocation8] sm:$0xff]  ;;  %v626_v30 = vld [vmem:[#allocation10] sm:$0xff]  ;;  %vm753_vm3 = vcmask 130048   ;;  %s2557_s30 = smov 120  }
  0xa6   : > { %v377_v16 = vsub.s32 0, %v376_v15  ;;  %v385_v17 = vsub.s32 2, %v376_v15  ;;  %v389_v19 = vsub.s32 3, %v376_v15  ;;  %v625_v33 = vld [vmem:[#allocation8 + $0x8] sm:$0xff]  ;;  %v627_v40 = vld [vmem:[#allocation10 + $0x8] sm:$0xff]  ;;  %v381_v47 = vsub.s32 1, %v376_v15 }
  0xa7   : > { %472 = vmatpush1.bf16.msra.mxu0 %v2253_v7  ;;  %525 = vmatpush1.bf16.msra.mxu1 %v2254_v8  ;;  %v393_v55 = vsub.s32 4, %v376_v15  ;;  %s2558_s9 = smov 112   ;;  %s2559_s13 = smov 104   ;;  %vm1676_vm4 = vcmask 195584  }
  0xa8   : > { %1998 = vmatprep.subr.bf16.mxu0 %v2256_v10  ;;  %2006 = vmatprep.subr.bf16.mxu1 %v2555_v13  ;;  %v378_v20 = vrot.slane %v373_v18, %v377_v16  ;;  %v386_v21 = vrot.slane %v373_v18, %v385_v17  ;;  %v390_v22 = vrot.slane %v373_v18, %v389_v19  ;;  %s2560_s15 = smov 8   ;;  %s2561_s17 = smov 16  }
  0xa9   : > { %v382_v1 = vrot.slane %v373_v18, %v381_v47  ;;  %v394_v6 = vrot.slane %v373_v18, %v393_v55  ;;  %s2562_s1 = smov 24   ;;  %s1908_s18 = sshll.u32 %s2818_s11, 5 }
  0xaa   : > { %1921 = vmatmul.mubr.msk.bf16.vlgmr.msra.gmra.mrb[0].mxu0 %vm462_vm0, %v2255_v9  ;;  %1923 = vmatmul.mubr.msk.bf16.vlgmr.msra.gmra.mrb[0].mxu1 %vm462_vm0, %v2255_v9  ;;  %s353_s23 = scalar_lea.vmem [#allocation11], %s1908_s18  ;;  %s2563_s14 = smov [#allocation11]  }
  0xab   : > { %1999 = vmatpush3.bf16.msra.mxu0 %v2256_v10  ;;  %511 = vmatprep.mubr.bf16.mxu0 %v2554_v0  ;;  %s2471_s20 = sshll.u32 %s2563_s14, 4  ;;  %s2472_s20 = int_to_ptr.vmem [resolvable:$false] %s2471_s20 }
  0xac   : > { %564 = vmatprep.mubr.bf16.mxu1 %v2554_v0  ;;  %2000 = vmatprep.subr.bf16.mxu0 %v2258_v11 }
  0xaf   : > { %2001 = vmatpush3.bf16.msra.mxu0 %v2258_v11 }
  0xb0   : > { %2012 = vmatprep.subr.bf16.mxu0 %v2555_v13 }
  0xb2   : > { %1922 = vmatmul.mubr.msk.bf16.gmra.mrb[4].mxu0 %vm462_vm0, %v2257_v12  ;;  %1924 = vmatmul.mubr.msk.bf16.gmra.mrb[4].mxu1 %vm462_vm0, %v2257_v12 }
  0xb3   : > { %2002 = vmatprep.mubr.msk.bf16.mxu0 %vm462_vm0, %v2255_v9  ;;  %2008 = vmatprep.mubr.msk.bf16.mxu1 %vm2556_vm1, %v2555_v13 }
  0xba   : > { %2003 = vmatmul.mubr.msk.bf16.vlgmr.msra.gmra.mrb[8].mxu0 %vm462_vm0, %v2257_v12 }
  0xbb   : > { %2014 = vmatprep.mubr.msk.bf16.mxu0 %vm2556_vm1, %v2555_v13 }
 0x17d   : > { %v503_v23 = vpop.f32.mrb[0].mxu0  ;;  %v556_v25 = vpop.f32.mrb[0].mxu1 }
 0x17e   : > { %v504_v26 = vadd.f32 %v503_v23, %v378_v20  ;;  %v557_v27 = vadd.f32 %v556_v25, %v386_v21  ;;  %v505_v28 = vpop.f32.mrb[1].mxu0  ;;  %v558_v29 = vpop.f32.mrb[1].mxu1 }
 0x17f   : > { %v559_v31 = vadd.f32 %v558_v29, %v390_v22  ;;  %v507_v32 = vpop.f32.mrb[2].mxu0  ;;  %v560_v34 = vpop.f32.mrb[2].mxu1  ;;  %v506_v10 = vadd.f32 %v505_v28, %v382_v1 }
 0x180   : > { %v628_v35 = vmul.f32 %v2850_v24, %v504_v26  ;;  %v508_v36 = vadd.f32 %v507_v32, %v378_v20  ;;  %v561_v37 = vadd.f32 %v560_v34, %v386_v21  ;;  %v509_v38 = vpop.f32.mrb[3].mxu0  ;;  %v562_v39 = vpop.f32.mrb[3].mxu1 }
 0x181   : > { %v632_v41 = vmul.f32 %v626_v30, %v559_v31  ;;  %v563_v42 = vadd.f32 %v562_v39, %v390_v22  ;;  %v510_v17 = vadd.f32 %v509_v38, %v382_v1  ;;  %v642_v18 = vmul.f32 %v2850_v24, %v506_v10 }
 0x182   : > { %v629_v43 = vmul.f32 %v625_v33, %v508_v36  ;;  %v2853_v44 = vpack.c.bf16 %v561_v37, %v557_v27 }
 0x183   : > { %v636_v45 = vadd.f32 %v632_v41, %v628_v35  ;;  %v633_v46 = vmul.f32 %v627_v40, %v563_v42  ;;  %v643_v34 = vmul.f32 %v625_v33, %v510_v17 }
 0x185   : > { %v637_v48 = vadd.f32 %v633_v46, %v629_v43  ;;  %v513_v49 = vpop.f32.mrb[4].mxu0  ;;  %v566_v50 = vpop.f32.mrb[4].mxu1 }
 0x186   : > { %v514_v51 = vadd.f32 %v513_v49, %v378_v20  ;;  %v567_v52 = vadd.f32 %v566_v50, %v386_v21  ;;  %v515_v53 = vpop.f32.mrb[5].mxu0  ;;  %v568_v54 = vpop.f32.mrb[5].mxu1 }
 0x187   : > { %v2855_v56 = vpack.c.bf16 %v637_v48, %v636_v45  ;;  %v569_v57 = vadd.f32 %v568_v54, %v390_v22  ;;  %v517_v58 = vpop.f32.mrb[6].mxu0  ;;  %v570_v59 = vpop.f32.mrb[6].mxu1  ;;  %v516_v9 = vadd.f32 %v515_v53, %v382_v1 }
 0x188   : > { %v630_v60 = vmul.f32 %v2850_v24, %v514_v51  ;;  %v518_v61 = vadd.f32 %v517_v58, %v378_v20  ;;  %v571_v62 = vadd.f32 %v570_v59, %v386_v21  ;;  %v519_v63 = vpop.f32.mrb[7].mxu0  ;;  %v572_v0 = vpop.f32.mrb[7].mxu1 }
 0x189   : > { %v634_v2 = vmul.f32 %v626_v30, %v569_v57  ;;  %v573_v3 = vadd.f32 %v572_v0, %v390_v22  ;;  %v520_v14 = vadd.f32 %v519_v63, %v382_v1  ;;  %v644_v22 = vmul.f32 %v2850_v24, %v516_v9 }
 0x18a   : > { %v631_v4 = vmul.f32 %v625_v33, %v518_v61  ;;  %v2858_v5 = vpack.c.bf16 %v571_v62, %v567_v52 }
 0x18b   : > { %v638_v7 = vadd.f32 %v634_v2, %v630_v60  ;;  %v635_v8 = vmul.f32 %v627_v40, %v573_v3  ;;  %v645_v28 = vmul.f32 %v625_v33, %v520_v14 }
 0x18d   : > { %v639_v11 = vadd.f32 %v635_v8, %v631_v4  ;;  %v2004_v12 = vpop.f32.mrb[8].mxu0 }
 0x18e   : > { %v618_v15 = vadd.f32 %v2004_v12, %v394_v6  ;;  %v609_v16 = vpop.f32.mrb[9].mxu0 }
 0x18f   : > { %v2860_v19 = vpack.c.bf16 %v639_v11, %v638_v7  ;;  %v610_v20 = vadd.f32 %v609_v16, %v394_v6  ;;  %v2005_v21 = vpop.f32.mrb[10].mxu0 }
 0x190   : > { %v648_v23 = vmul.f32 %v626_v30, %v618_v15  ;;  %v621_v25 = vadd.f32 %v2005_v21, %v394_v6  ;;  %v612_v26 = vpop.f32.mrb[11].mxu0 }
 0x191   : > { %v646_v27 = vmul.f32 %v626_v30, %v610_v20  ;;  %v613_v29 = vadd.f32 %v612_v26, %v394_v6 }
 0x192   : > { %v652_v31 = vadd.f32 %v648_v23, %v644_v22  ;;  %v649_v32 = vmul.f32 %v627_v40, %v621_v25 }
 0x193   : > { %v650_v35 = vadd.f32 %v646_v27, %v642_v18  ;;  %v647_v36 = vmul.f32 %v627_v40, %v613_v29 }
 0x194   : > { %v653_v37 = vadd.f32 %v649_v32, %v645_v28 }
 0x195   : > { %v651_v38 = vadd.f32 %v647_v36, %v643_v34 }
 0x196   : > { %v2864_v39 = vpack.c.bf16 %v653_v37, %v652_v31 }
 0x197   : > { %v2866_v41 = vpack.c.bf16 %v651_v38, %v650_v35 }
 0x198   : > { %v710_v42 = vsel %vm658_vm2, %v2864_v39, 0 }
 0x199   : > { %2013 = vmatpush3.bf16.xpose.msra.mxu0 %v710_v42  ;;  %v663_v24 = vsel %vm658_vm2, %v2866_v41, 0 }
 0x19a   : > { %2007 = vmatpush3.bf16.xpose.msra.mxu1 %v663_v24  ;;  %2024 = vmatprep.subr.bf16.mxu0 %v2555_v13 }
 0x19b   : > { %2018 = vmatprep.subr.bf16.mxu1 %v2555_v13 }
 0x1a0   : > { %2015 = vmatmul.mubr.msk.bf16.vlgmr.msra.gmra.mrb[12].mxu0 %vm658_vm2, %v2860_v19 }
 0x1a1   : > { %2009 = vmatmul.mubr.msk.bf16.vlgmr.msra.gmra.mrb[8].mxu1 %vm658_vm2, %v2855_v56  ;;  %2025 = vmatpush3.bf16.msra.mxu0 %v2858_v5 }
 0x1a2   : > { %2019 = vmatpush3.bf16.msra.mxu1 %v2853_v44  ;;  %2026 = vmatprep.mubr.msk.bf16.mxu0 %vm2556_vm1, %v2555_v13 }
 0x1a3   : > { %2036 = vmatprep.subr.bf16.mxu0 %v2555_v13  ;;  %2020 = vmatprep.mubr.msk.bf16.mxu1 %vm2556_vm1, %v2555_v13 }
 0x1a4   : > { %2030 = vmatprep.subr.bf16.mxu1 %v2555_v13 }
 0x273   : > { %v746_v30 = vpop.f32.mrb[12].mxu0 }
 0x274   : > { %v699_v33 = vpop.f32.mrb[8].mxu1  ;;  %v2016_v40 = vpop.f32.mrb[13].mxu0  ;;  %v760_v43 = vsel %vm753_vm3, %v746_v30, -inf }
 0x275   : > { %761 = vmax.xlane.f32.xlu1 %v760_v43  ;;  %v2010_v45 = vpop.f32.mrb[9].mxu1  ;;  %v749_v46 = vpop.f32.mrb[14].mxu0  ;;  %v754_v47 = vsel %vm753_vm3, %v699_v33, -inf }
 0x276   : > { %v2017_v48 = vpop.f32.mrb[15].mxu0  ;;  %755 = vmax.xlane.f32.xlu0 %v754_v47  ;;  %v702_v49 = vpop.f32.mrb[10].mxu1  ;;  %v763_v51 = vsel %vm753_vm3, %v749_v46, -inf }
 0x277   : > { %v2011_v50 = vpop.f32.mrb[11].mxu1  ;;  %v757_v52 = vsel %vm753_vm3, %v702_v49, -inf }
 0x279   : > { %764 = vmax.xlane.f32.xlu1 %v763_v51 }
 0x27a   : > { %758 = vmax.xlane.f32.xlu0 %v757_v52 }
 0x28a   : > { %945 = vrot.lane.b32.xlu1 %v2864_v39, %s2557_s30 }
 0x28e   : > { %889 = vrot.lane.b32.xlu1 %v2855_v56, %s2557_s30 }
 0x290   : > { %892 = vrot.lane.b32.xlu0 %v2866_v41, %s2557_s30 }
 0x292   : > { %942 = vrot.lane.b32.xlu1 %v2860_v19, %s2557_s30 }
 0x296   : > { %1085 = vrot.lane.b32.xlu1 %v2858_v5, %s2557_s30 }
 0x29a   : > { %1138 = vrot.lane.b32.xlu1 %v2866_v41, %s2558_s9 }
 0x302   : > { %v762_v53 = vpop.xlane.xlu1 %761 }
 0x303   : > { %v768_v54 = vsub.f32 %v746_v30, %v762_v53  ;;  %v756_v55 = vpop.xlane.xlu0 %755 }
 0x304   : > { %v766_v57 = vsub.f32 %v699_v33, %v756_v55 }
 0x305   : > { %v774_v58 = vmul.f32 1.442695, %v768_v54 }
 0x306   : > { %v770_v59 = vmul.f32 1.442695, %v766_v57  ;;  %v765_v60 = vpop.xlane.xlu1 %764 }
 0x307   : > { %v769_v61 = vsub.f32 %v749_v46, %v765_v60  ;;  %v759_v62 = vpop.xlane.xlu0 %758  ;;  %2261 = vpow2.f32 %v774_v58 }
 0x308   : > { %v767_v63 = vsub.f32 %v702_v49, %v759_v62  ;;  %2263 = vpow2.f32 %v770_v59 }
 0x309   : > { %v776_v0 = vmul.f32 1.442695, %v769_v61 }
 0x30a   : > { %v772_v1 = vmul.f32 1.442695, %v767_v63  ;;  %v946_v2 = vpop.permute.xlu1 %945 }
 0x30b   : > { %2265 = vpow2.f32 %v776_v0  ;;  %v893_v9 = vpop.permute.xlu0 %892  ;;  %v951_v12 = vsel %vm658_vm2, %v946_v2, 0 }
 0x30c   : > { %2267 = vpow2.f32 %v772_v1  ;;  %v898_v14 = vsel %vm658_vm2, %v893_v9, 0 }
 0x30e   : > { %v890_v6 = vpop.permute.xlu1 %889 }
 0x311   : > { %v2902_v3 = vpop.eup %2261 }
 0x312   : > { %v2904_v4 = vpop.eup %2263  ;;  %v943_v15 = vpop.permute.xlu1 %942 }
 0x315   : > { %v2906_v7 = vpop.eup %2265 }
 0x316   : > { %v2908_v8 = vpop.eup %2267  ;;  %v795_v10 = vpack.c.bf16 %v2906_v7, %v2902_v3  ;;  %v1086_v16 = vpop.permute.xlu1 %1085 }
 0x317   : > { %v794_v11 = vpack.c.bf16 %v2908_v8, %v2904_v4 }
 0x318   : > { %2027 = vmatmul.mubr.msk.bf16.vlgmr.msra.gmra.mrb[16].mxu0 %vm753_vm3, %v795_v10 }
 0x319   : > { %2037 = vmatpush3.bf16.xpose.msra.mxu0 %v951_v12  ;;  %2021 = vmatmul.mubr.msk.bf16.vlgmr.msra.gmra.mrb[12].mxu1 %vm753_vm3, %v794_v11 }
 0x31a   : > { %2031 = vmatpush3.bf16.xpose.msra.mxu1 %v898_v14  ;;  %2038 = vmatprep.mubr.msk.bf16.mxu0 %vm2556_vm1, %v2555_v13  ;;  %v1139_v30 = vpop.permute.xlu1 %1138 }
 0x31b   : > { %2048 = vmatprep.subr.bf16.mxu0 %v2555_v13  ;;  %2032 = vmatprep.mubr.msk.bf16.mxu1 %vm2556_vm1, %v2555_v13  ;;  %v1144_v59 = vsel %vm658_vm2, %v1139_v30, 0 }
 0x31c   : > { %2042 = vmatprep.subr.bf16.mxu1 %v2555_v13 }
 0x320   : > { %2039 = vmatmul.mubr.msk.bf16.vlgmr.msra.gmra.mrb[20].mxu0 %vm658_vm2, %v943_v15 }
 0x321   : > { %2049 = vmatpush3.bf16.msra.mxu0 %v1086_v16  ;;  %2033 = vmatmul.mubr.msk.bf16.vlgmr.msra.gmra.mrb[16].mxu1 %vm658_vm2, %v890_v6 }
 0x322   : > { %2044 = vmatprep.mubr.msk.bf16.mxu1 %vm2556_vm1, %v2555_v13  ;;  %2050 = vmatprep.mubr.msk.bf16.mxu0 %vm2556_vm1, %v2555_v13 }
 0x323   : > { %2060 = vmatprep.subr.bf16.mxu0 %v2555_v13 }
 0x3eb   : > { %v2931_v17 = vpop.f32.mrb[16].mxu0 }
 0x3ec   : > { %v2933_v20 = vpop.f32.mrb[12].mxu1  ;;  %v2028_v21 = vpop.f32.mrb[17].mxu0 }
 0x3ed   : > { %v2022_v22 = vpop.f32.mrb[13].mxu1  ;;  %v2935_v23 = vpop.f32.mrb[18].mxu0 }
 0x3ee   : > { %v2937_v25 = vpop.f32.mrb[14].mxu1  ;;  %v2029_v26 = vpop.f32.mrb[19].mxu0 }
 0x3ef   : > { %v2023_v18 = vpop.f32.mrb[15].mxu1 }
 0x3f3   : > { %v987_v27 = vpop.f32.mrb[20].mxu0 }
 0x3f4   : > { %v934_v29 = vpop.f32.mrb[16].mxu1  ;;  %v2040_v28 = vpop.f32.mrb[21].mxu0  ;;  %v1000_v31 = vsel %vm753_vm3, %v987_v27, -inf }
 0x3f5   : > { %v990_v32 = vpop.f32.mrb[22].mxu0  ;;  %1001 = vmax.xlane.f32.xlu0 %v1000_v31  ;;  %v2034_v34 = vpop.f32.mrb[17].mxu1  ;;  %v994_v42 = vsel %vm753_vm3, %v934_v29, -inf }
 0x3f6   : > { %v937_v35 = vpop.f32.mrb[18].mxu1  ;;  %v2041_v36 = vpop.f32.mrb[23].mxu0  ;;  %v1003_v24 = vsel %vm753_vm3, %v990_v32, -inf }
 0x3f7   : > { %v2035_v37 = vpop.f32.mrb[19].mxu1  ;;  %v997_v38 = vsel %vm753_vm3, %v937_v35, -inf }
 0x3f8   : > { %998 = vmax.xlane.f32.xlu1 %v997_v38 }
 0x3f9   : > { %995 = vmax.xlane.f32.xlu0 %v994_v42 }
 0x3fd   : > { %1004 = vmax.xlane.f32.xlu0 %v1003_v24 }
 0x409   : > { %1189 = vrot.lane.b32.xlu1 %v2864_v39, %s2558_s9 }
 0x40d   : > { %1187 = vrot.lane.b32.xlu1 %v2860_v19, %s2558_s9 }
 0x411   : > { %1327 = vrot.lane.b32.xlu1 %v2858_v5, %s2558_s9 }
 0x413   : > { %1037 = vrot.lane.b32.xlu0 %v2853_v44, %s2557_s30  ;;  %s1780_s30 = sshll.u32 %s353_s23, 4  ;;  %s3104_s30 = int_to_ptr.vmem [resolvable:$true] %s1780_s30 }
 0x414   : > { %s2467_s19 = scalar_lea.vmem %s3104_s30, 512  ;;  %p2474_p3 = scmp.lt.s32.totalorder %s3104_s30, %s2472_s20 }
 0x415   : > { %1380 = vrot.lane.b32.xlu1 %v2866_v41, %s2559_s13  ;;  %p2468_p4 = scmp.ne.s32.totalorder %s3104_s30, %s2467_s19 }
 0x417   : > { %1136 = vrot.lane.b32.xlu0 %v2855_v56, %s2558_s9  ;;  %p2469_p8 = pnand %p2468_p4, %p2769_p6 }
 0x419   : > { %p2470_p13 = pneg %p2469_p8 }
 0x482   : > { %v1002_v33 = vpop.xlane.xlu0 %1001 }
 0x483   : > { %v1008_v43 = vsub.f32 %v987_v27, %v1002_v33 }
 0x485   : > { %v999_v40 = vpop.xlane.xlu1 %998  ;;  %v1014_v50 = vmul.f32 1.442695, %v1008_v43 }
 0x486   : > { %v1007_v45 = vsub.f32 %v937_v35, %v999_v40  ;;  %v996_v46 = vpop.xlane.xlu0 %995 }
 0x487   : > { %v1006_v47 = vsub.f32 %v934_v29, %v996_v46 }
 0x488   : > { %v1012_v48 = vmul.f32 1.442695, %v1007_v45 }
 0x489   : > { %v1010_v49 = vmul.f32 1.442695, %v1006_v47  ;;  %v1190_v60 = vpop.permute.xlu1 %1189 }
 0x48a   : > { %2269 = vpow2.f32 %v1012_v48  ;;  %v1005_v51 = vpop.xlane.xlu0 %1004  ;;  %v1195_v63 = vsel %vm658_vm2, %v1190_v60, 0 }
 0x48b   : > { %2271 = vpow2.f32 %v1010_v49  ;;  %v1009_v52 = vsub.f32 %v990_v32, %v1005_v51 }
 0x48c   : > { %2273 = vpow2.f32 %v1014_v50 }
 0x48d   : > { %v1016_v53 = vmul.f32 1.442695, %v1009_v52  ;;  %v1188_v0 = vpop.permute.xlu1 %1187 }
 0x48e   : > { %v1038_v41 = vpop.permute.xlu0 %1037 }
 0x48f   : > { %2275 = vpow2.f32 %v1016_v53  ;;  %2043 = vmatpush3.bf16.msra.mxu1 %v1038_v41 }
 0x490   : > { %2054 = vmatprep.subr.bf16.mxu1 %v2555_v13 }
 0x491   : > { %v1328_v2 = vpop.permute.xlu1 %1327 }
 0x492   : > { %v1137_v1 = vpop.permute.xlu0 %1136 }
 0x494   : > { %v2956_v54 = vpop.eup %2269 }
 0x495   : > { %v2958_v55 = vpop.eup %2271  ;;  %v1381_v37 = vpop.permute.xlu1 %1380 }
 0x496   : > { %v1034_v57 = vpack.c.bf16 %v2956_v54, %v2958_v55  ;;  %v2962_v58 = vpop.eup %2273  ;;  %v1386_v52 = vsel %vm658_vm2, %v1381_v37, 0 }
 0x498   : > { %2045 = vmatmul.mubr.msk.bf16.vlgmr.msra.gmra.mrb[20].mxu1 %vm753_vm3, %v1034_v57 }
 0x499   : > { %v2966_v61 = vpop.eup %2275  ;;  %2055 = vmatpush3.bf16.xpose.msra.mxu1 %v1144_v59  ;;  %2056 = vmatprep.mubr.msk.bf16.mxu1 %vm2556_vm1, %v2555_v13 }
 0x49a   : > { %v1035_v62 = vpack.c.bf16 %v2966_v61, %v2962_v58  ;;  %2066 = vmatprep.subr.bf16.mxu1 %v2555_v13  ;;  %v1027_v37 = vsel %vm753_vm3, %v2966_v61, 0.0 }
 0x49c   : > { %2051 = vmatmul.mubr.msk.bf16.vlgmr.msra.gmra.mrb[24].mxu0 %vm753_vm3, %v1035_v62 }
 0x49d   : > { %2061 = vmatpush3.bf16.xpose.msra.mxu0 %v1195_v63  ;;  %2062 = vmatprep.mubr.msk.bf16.mxu0 %vm2556_vm1, %v2555_v13 }
 0x49e   : > { %2072 = vmatprep.subr.bf16.mxu0 %v2555_v13 }
 0x4a0   : > { %2057 = vmatmul.mubr.msk.bf16.vlgmr.msra.gmra.mrb[24].mxu1 %vm658_vm2, %v1137_v1 }
 0x4a1   : > { %2068 = vmatprep.mubr.msk.bf16.mxu1 %vm2556_vm1, %v2555_v13 }
 0x4a4   : > { %2063 = vmatmul.mubr.msk.bf16.vlgmr.msra.gmra.mrb[28].mxu0 %vm658_vm2, %v1188_v0 }
 0x4a5   : > { %2073 = vmatpush3.bf16.msra.mxu0 %v1328_v2  ;;  %2074 = vmatprep.mubr.msk.bf16.mxu0 %vm2556_vm1, %v2555_v13 }
 0x4a6   : > { %2084 = vmatprep.subr.bf16.mxu0 %v2555_v13 }
 0x56b   : > { %v2985_v6 = vpop.f32.mrb[20].mxu1 }
 0x56c   : > { %v2046_v9 = vpop.f32.mrb[21].mxu1 }
 0x56d   : > { %v2987_v10 = vpop.f32.mrb[22].mxu1 }
 0x56e   : > { %v2047_v11 = vpop.f32.mrb[23].mxu1 }
 0x56f   : > { %v2989_v12 = vpop.f32.mrb[24].mxu0 }
 0x570   : > { %v2052_v14 = vpop.f32.mrb[25].mxu0 }
 0x571   : > { %v2991_v15 = vpop.f32.mrb[26].mxu0 }
 0x572   : > { %v2053_v16 = vpop.f32.mrb[27].mxu0 }
 0x573   : > { %v1180_v21 = vpop.f32.mrb[24].mxu1 }
 0x574   : > { %v2058_v22 = vpop.f32.mrb[25].mxu1  ;;  %v1238_v35 = vsel %vm753_vm3, %v1180_v21, -inf }
 0x575   : > { %v1183_v26 = vpop.f32.mrb[26].mxu1 }
 0x576   : > { %v2059_v18 = vpop.f32.mrb[27].mxu1  ;;  %v1241_v27 = vsel %vm753_vm3, %v1183_v26, -inf }
 0x577   : > { %v1231_v29 = vpop.f32.mrb[28].mxu0  ;;  %1242 = vmax.xlane.f32.xlu1 %v1241_v27 }
 0x578   : > { %v2064_v28 = vpop.f32.mrb[29].mxu0  ;;  %v1244_v31 = vsel %vm753_vm3, %v1231_v29, -inf }
 0x579   : > { %1245 = vmax.xlane.f32.xlu0 %v1244_v31  ;;  %v1234_v32 = vpop.f32.mrb[30].mxu0 }
 0x57a   : > { %v2065_v34 = vpop.f32.mrb[31].mxu0  ;;  %v1247_v36 = vsel %vm753_vm3, %v1234_v32, -inf }
 0x57d   : > { %1239 = vmax.xlane.f32.xlu0 %v1238_v35 }
 0x581   : > { %1248 = vmax.xlane.f32.xlu0 %v1247_v36  ;;  %v1018_v36 = vsel %vm753_vm3, %v2958_v55, 0.0 }
 0x588   : > { %1431 = vrot.lane.b32.xlu1 %v2864_v39, %s2559_s13 }
 0x58c   : > { %1429 = vrot.lane.b32.xlu1 %v2860_v19, %s2559_s13 }
 0x597   : > { %1280 = vrot.lane.b32.xlu0 %v2853_v44, %s2558_s9  ;;  %s1957_s9 = sshll.u32 %s2626_s28, 9  ;;  %s1766_s28 = scalar_lea.sflag [#allocation4], %s2818_s11 }
 0x598   : > { %s3110_s16 = scalar_lea.hbm %s3163_s7, %s1957_s9 }
 0x59b   : > { %1378 = vrot.lane.b32.xlu0 %v2855_v56, %s2559_s13 }
 0x604   : > { %v1243_v38 = vpop.xlane.xlu1 %1242 }
 0x605   : > { %v1251_v42 = vsub.f32 %v1183_v26, %v1243_v38 }
 0x606   : > { %v1246_v24 = vpop.xlane.xlu0 %1245 }
 0x607   : > { %v1256_v30 = vmul.f32 1.442695, %v1251_v42  ;;  %v1252_v33 = vsub.f32 %v1231_v29, %v1246_v24  ;;  %v1021_v42 = vsel %vm753_vm3, %v2956_v54, 0.0 }
 0x608   : > { %v1432_v41 = vpop.permute.xlu1 %1431 }
 0x609   : > { %2277 = vpow2.f32 %v1256_v30  ;;  %v1258_v39 = vmul.f32 1.442695, %v1252_v33  ;;  %v1437_v59 = vsel %vm658_vm2, %v1432_v41, 0 }
 0x60a   : > { %v1240_v40 = vpop.xlane.xlu0 %1239 }
 0x60b   : > { %v1250_v43 = vsub.f32 %v1180_v21, %v1240_v40 }
 0x60c   : > { %v1430_v62 = vpop.permute.xlu1 %1429 }
 0x60d   : > { %v1254_v45 = vmul.f32 1.442695, %v1250_v43 }
 0x60e   : > { %v1249_v46 = vpop.xlane.xlu0 %1248 }
 0x60f   : > { %2279 = vpow2.f32 %v1254_v45  ;;  %v1253_v19 = vsub.f32 %v1234_v32, %v1249_v46 }
 0x610   : > { %2281 = vpow2.f32 %v1258_v39 }
 0x611   : > { %v1260_v47 = vmul.f32 1.442695, %v1253_v19 }
 0x612   : > { %v1281_v48 = vpop.permute.xlu0 %1280 }
 0x613   : > { %2283 = vpow2.f32 %v1260_v47  ;;  %2067 = vmatpush3.bf16.msra.mxu1 %v1281_v48  ;;  %v2278_v56 = vpop.eup %2277 }
 0x614   : > { %2078 = vmatprep.subr.bf16.mxu1 %v2555_v13  ;;  %v1265_v38 = vsel %vm753_vm3, %v2278_v56, 0.0 }
 0x616   : > { %v1379_v60 = vpop.permute.xlu0 %1378 }
 0x619   : > { %v2280_v49 = vpop.eup %2279 }
 0x61a   : > { %v1278_v50 = vpack.c.bf16 %v2278_v56, %v2280_v49  ;;  %v2282_v51 = vpop.eup %2281  ;;  %v1262_v55 = vsel %vm753_vm3, %v2280_v49, 0.0 }
 0x61b   : > { %v1268_v61 = vsel %vm753_vm3, %v2282_v51, 0.0 }
 0x61c   : > { %2069 = vmatmul.mubr.msk.bf16.vlgmr.msra.gmra.mrb[28].mxu1 %vm753_vm3, %v1278_v50 }
 0x61d   : > { %v2284_v53 = vpop.eup %2283  ;;  %2079 = vmatpush3.bf16.xpose.msra.mxu1 %v1386_v52  ;;  %2080 = vmatprep.mubr.msk.bf16.mxu1 %vm2556_vm1, %v2555_v13 }
 0x61e   : > { %v1279_v57 = vpack.c.bf16 %v2284_v53, %v2282_v51  ;;  %2090 = vmatprep.subr.bf16.mxu1 %v2555_v13 }
 0x620   : > { %2075 = vmatmul.mubr.msk.bf16.vlgmr.msra.gmra.mrb[32].mxu0 %vm753_vm3, %v1279_v57 }
 0x621   : > { %2085 = vmatpush3.bf16.xpose.msra.mxu0 %v1437_v59  ;;  %2086 = vmatprep.mubr.msk.bf16.mxu0 %vm2556_vm1, %v2555_v13 }
 0x622   : > { %2096 = vmatprep.subr.bf16.mxu0 %v2555_v13 }
 0x624   : > { %2081 = vmatmul.mubr.msk.bf16.vlgmr.msra.gmra.mrb[32].mxu1 %vm658_vm2, %v1379_v60 }
 0x625   : > { %2092 = vmatprep.mubr.msk.bf16.mxu1 %vm2556_vm1, %v2555_v13 }
 0x628   : > { %2087 = vmatmul.mubr.msk.bf16.vlgmr.msra.gmra.mrb[36].mxu0 %vm658_vm2, %v1430_v62 }
 0x629   : > { %2098 = vmatprep.mubr.msk.bf16.mxu0 %vm2556_vm1, %v2555_v13 }
 0x6ef   : > { %v3022_v63 = vpop.f32.mrb[28].mxu1 }
 0x6f0   : > { %v2070_v0 = vpop.f32.mrb[29].mxu1 }
 0x6f1   : > { %v3024_v1 = vpop.f32.mrb[30].mxu1  ;;  %v778_v0 = vsel %vm753_vm3, %v2904_v4, 0.0 }
 0x6f2   : > { %v2071_v2 = vpop.f32.mrb[31].mxu1 }
 0x6f3   : > { %v3026_v9 = vpop.f32.mrb[32].mxu0  ;;  %v781_v2 = vsel %vm753_vm3, %v2908_v8, 0.0 }
 0x6f4   : > { %v2076_v11 = vpop.f32.mrb[33].mxu0 }
 0x6f5   : > { %v3028_v14 = vpop.f32.mrb[34].mxu0  ;;  %v784_v11 = vsel %vm753_vm3, %v2902_v3, 0.0 }
 0x6f6   : > { %v2077_v16 = vpop.f32.mrb[35].mxu0 }
 0x6f7   : > { %v1422_v21 = vpop.f32.mrb[32].mxu1  ;;  %v787_v16 = vsel %vm753_vm3, %v2906_v7, 0.0 }
 0x6f8   : > { %v2082_v22 = vpop.f32.mrb[33].mxu1  ;;  %v1480_v34 = vsel %vm753_vm3, %v1422_v21, -inf }
 0x6f9   : > { %v1425_v26 = vpop.f32.mrb[34].mxu1 }
 0x6fa   : > { %v2083_v18 = vpop.f32.mrb[35].mxu1  ;;  %v1483_v27 = vsel %vm753_vm3, %v1425_v26, -inf }
 0x6fb   : > { %v1473_v29 = vpop.f32.mrb[36].mxu0  ;;  %1484 = vmax.xlane.f32.xlu1 %v1483_v27 }
 0x6fc   : > { %v2088_v13 = vpop.f32.mrb[37].mxu0  ;;  %v1486_v28 = vsel %vm753_vm3, %v1473_v29, -inf }
 0x6fd   : > { %1487 = vmax.xlane.f32.xlu0 %v1486_v28  ;;  %v1476_v31 = vpop.f32.mrb[38].mxu0 }
 0x6fe   : > { %v2089_v32 = vpop.f32.mrb[39].mxu0  ;;  %v1489_v35 = vsel %vm753_vm3, %v1476_v31, -inf }
 0x701   : > { %1481 = vmax.xlane.f32.xlu0 %v1480_v34 }
 0x705   : > { %1490 = vmax.xlane.f32.xlu0 %v1489_v35 }
 0x70c   : > { %1569 = vrot.lane.b32.xlu1 %v2858_v5, %s2559_s13  ;;  %v1271_v5 = vsel %vm753_vm3, %v2284_v53, 0.0 }
 0x71b   : > { %1522 = vrot.lane.b32.xlu0 %v2853_v44, %s2559_s13  ;;  %v1024_v44 = vsel %vm753_vm3, %v2962_v58, 0.0 }
 0x730   : > { %1019 = vadd.xlane.f32.xlu1 %v1018_v36 }
 0x734   : > { %1028 = vadd.xlane.f32.xlu1 %v1027_v37 }
 0x738   : > { %1266 = vadd.xlane.f32.xlu1 %v1265_v38 }
 0x73a   : > { %1022 = vadd.xlane.f32.xlu0 %v1021_v42 }
 0x73c   : > { %1272 = vadd.xlane.f32.xlu1 %v1271_v5 }
 0x73e   : > { %1025 = vadd.xlane.f32.xlu0 %v1024_v44 }
 0x742   : > { %1263 = vadd.xlane.f32.xlu0 %v1262_v55 }
 0x746   : > { %1269 = vadd.xlane.f32.xlu0 %v1268_v61 }
 0x788   : > { %v1485_v24 = vpop.xlane.xlu1 %1484 }
 0x789   : > { %v1493_v30 = vsub.f32 %v1425_v26, %v1485_v24 }
 0x78a   : > { %v1488_v33 = vpop.xlane.xlu0 %1487 }
 0x78b   : > { %v1498_v40 = vmul.f32 1.442695, %v1493_v30  ;;  %v1494_v54 = vsub.f32 %v1473_v29, %v1488_v33 }
 0x78c   : > { %v1570_v43 = vpop.permute.xlu1 %1569 }
 0x78d   : > { %2285 = vpow2.f32 %v1498_v40  ;;  %2097 = vmatpush3.bf16.msra.mxu0 %v1570_v43  ;;  %v1500_v46 = vmul.f32 1.442695, %v1494_v54 }
 0x78e   : > { %v1482_v45 = vpop.xlane.xlu0 %1481 }
 0x78f   : > { %v1492_v39 = vsub.f32 %v1422_v21, %v1482_v45 }
 0x791   : > { %v1496_v19 = vmul.f32 1.442695, %v1492_v39 }
 0x792   : > { %v1491_v58 = vpop.xlane.xlu0 %1490 }
 0x793   : > { %2287 = vpow2.f32 %v1496_v19  ;;  %v1495_v47 = vsub.f32 %v1476_v31, %v1491_v58 }
 0x794   : > { %2289 = vpow2.f32 %v1500_v46 }
 0x795   : > { %v1502_v48 = vmul.f32 1.442695, %v1495_v47 }
 0x796   : > { %v1523_v56 = vpop.permute.xlu0 %1522 }
 0x797   : > { %v2286_v49 = vpop.eup %2285  ;;  %2291 = vpow2.f32 %v1502_v48  ;;  %2091 = vmatpush3.bf16.msra.mxu1 %v1523_v56 }
 0x798   : > { %v1507_v50 = vsel %vm753_vm3, %v2286_v49, 0.0 }
 0x799   : > { %1508 = vadd.xlane.f32.xlu1 %v1507_v50 }
 0x79d   : > { %v2288_v51 = vpop.eup %2287 }
 0x79e   : > { %v1504_v52 = vsel %vm753_vm3, %v2288_v51, 0.0  ;;  %v1520_v53 = vpack.c.bf16 %v2286_v49, %v2288_v51  ;;  %v2290_v41 = vpop.eup %2289 }
 0x79f   : > { %1505 = vadd.xlane.f32.xlu0 %v1504_v52  ;;  %v1510_v59 = vsel %vm753_vm3, %v2290_v41, 0.0 }
 0x7a0   : > { %2093 = vmatmul.mubr.msk.bf16.vlgmr.msra.gmra.mrb[36].mxu1 %vm753_vm3, %v1520_v53 }
 0x7a1   : > { %v2292_v57 = vpop.eup %2291 }
 0x7a2   : > { %v1513_v60 = vsel %vm753_vm3, %v2292_v57, 0.0  ;;  %v1521_v62 = vpack.c.bf16 %v2292_v57, %v2290_v41 }
 0x7a3   : > { %1511 = vadd.xlane.f32.xlu0 %v1510_v59  ;;  %1514 = vadd.xlane.f32.xlu1 %v1513_v60 }
 0x7a4   : > { %2099 = vmatmul.mubr.msk.bf16.vlgmr.msra.gmra.mrb[40].mxu0 %vm753_vm3, %v1521_v62 }
 0x7a7   : > { %779 = vadd.xlane.f32.xlu0 %v778_v0  ;;  %782 = vadd.xlane.f32.xlu1 %v781_v2 }
 0x7ab   : > { %785 = vadd.xlane.f32.xlu0 %v784_v11  ;;  %788 = vadd.xlane.f32.xlu1 %v787_v16 }
 0x7bd   : > { %v1020_v21 = vpop.xlane.xlu1 %1019 }
 0x7be   : > { %2293 = vrcp.f32 %v1020_v21 }
 0x7c1   : > { %v1029_v22 = vpop.xlane.xlu1 %1028 }
 0x7c5   : > { %v1267_v18 = vpop.xlane.xlu1 %1266 }
 0x7c7   : > { %v1023_v26 = vpop.xlane.xlu0 %1022 }
 0x7c8   : > { %2295 = vrcp.f32 %v1023_v26  ;;  %v2294_v29 = vpop.eup %2293 }
 0x7c9   : > { %2297 = vrcp.f32 %v1029_v22  ;;  %v1273_v8 = vpop.xlane.xlu1 %1272  ;;  %v1132_v7 = vmul.f32 %v2294_v29, %v2985_v6 }
 0x7cb   : > { %v1026_v4 = vpop.xlane.xlu0 %1025 }
 0x7cc   : > { %2299 = vrcp.f32 %v1026_v4 }
 0x7cd   : > { %2301 = vrcp.f32 %v1267_v18 }
 0x7cf   : > { %v1264_v27 = vpop.xlane.xlu0 %1263 }
 0x7d0   : > { %2303 = vrcp.f32 %v1264_v27 }
 0x7d1   : > { %2305 = vrcp.f32 %v1273_v8 }
 0x7d2   : > { %v2296_v3 = vpop.eup %2295 }
 0x7d3   : > { %v1270_v13 = vpop.xlane.xlu0 %1269  ;;  %v1133_v28 = vmul.f32 %v2296_v3, %v2987_v10  ;;  %v2298_v31 = vpop.eup %2297 }
 0x7d4   : > { %2307 = vrcp.f32 %v1270_v13  ;;  %v1135_v36 = vmul.f32 %v2298_v31, %v2991_v15 }
 0x7d5   : > { %v2213_v32 = vpack.i.bf16 %v1133_v28, %v1132_v7 }
 0x7d6   : > { %v2300_v34 = vpop.eup %2299 }
 0x7d7   : > { %2214 = vrot.lane.b32.xlu0 %v2213_v32, %s2560_s15  ;;  %v1134_v35 = vmul.f32 %v2300_v34, %v2989_v12  ;;  %v2302_v37 = vpop.eup %2301 }
 0x7d8   : > { %v1375_v10 = vmul.f32 %v2302_v37, %v3024_v1  ;;  %v2260_v1 = vld [vmem:[%s3161_s5 + $0x8] sm:$0xff]  }
 0x7d9   : > { %v2218_v38 = vpack.i.bf16 %v1135_v36, %v1134_v35 }
 0x7da   : > { %v2304_v42 = vpop.eup %2303 }
 0x7db   : > { %2219 = vrot.lane.b32.xlu1 %v2218_v38, %s2560_s15  ;;  %v1374_v6 = vmul.f32 %v2304_v42, %v3022_v63  ;;  %v2306_v5 = vpop.eup %2305  ;;  %v2259_v63 = vld [vmem:[%s3161_s5] sm:$0xff]  }
 0x7dc   : > { %v1377_v12 = vmul.f32 %v2306_v5, %v3028_v14  ;;  %2102 = vmatprep.subr.bf16.mxu1 %v2259_v63 }
 0x7dd   : > { %v2223_v44 = vpack.i.bf16 %v1375_v10, %v1374_v6  ;;  %2103 = vmatpush3.bf16.msra.mxu1 %v2259_v63  ;;  %v1943_v63 = vld [vmem:[%s3162_s6] ss:$0 sm:$0xff] }
 0x7de   : > { %v2308_v55 = vpop.eup %2307  ;;  %2104 = vmatprep.subr.bf16.mxu1 %v2260_v1 }
 0x7df   : > { %2224 = vrot.lane.b32.xlu1 %v2223_v44, %s2561_s17  ;;  %v1376_v61 = vmul.f32 %v2308_v55, %v3026_v9 }
 0x7e1   : > { %v2228_v24 = vpack.i.bf16 %v1377_v12, %v1376_v61  ;;  %2105 = vmatpush3.bf16.msra.mxu1 %v2260_v1 }
 0x7e3   : > { %2229 = vrot.lane.b32.xlu1 %v2228_v24, %s2561_s17 }
 0x826   : > { %v1509_v30 = vpop.xlane.xlu1 %1508 }
 0x827   : > { %2309 = vrcp.f32 %v1509_v30 }
 0x82c   : > { %v1506_v15 = vpop.xlane.xlu0 %1505 }
 0x82d   : > { %2311 = vrcp.f32 %v1506_v15 }
 0x830   : > { %v1512_v33 = vpop.xlane.xlu0 %1511  ;;  %v1515_v40 = vpop.xlane.xlu1 %1514 }
 0x831   : > { %2313 = vrcp.f32 %v1512_v33  ;;  %v2310_v14 = vpop.eup %2309 }
 0x832   : > { %2315 = vrcp.f32 %v1515_v40 }
 0x834   : > { %v783_v57 = vpop.xlane.xlu1 %782  ;;  %v780_v59 = vpop.xlane.xlu0 %779 }
 0x835   : > { %2317 = vrcp.f32 %v780_v59 }
 0x836   : > { %2319 = vrcp.f32 %v783_v57 }
 0x837   : > { %v2312_v54 = vpop.eup %2311 }
 0x838   : > { %v789_v60 = vpop.xlane.xlu1 %788  ;;  %v786_v62 = vpop.xlane.xlu0 %785 }
 0x839   : > { %2321 = vrcp.f32 %v786_v62 }
 0x83a   : > { %2323 = vrcp.f32 %v789_v60 }
 0x83b   : > { %v2314_v47 = vpop.eup %2313 }
 0x83c   : > { %v2316_v49 = vpop.eup %2315 }
 0x83f   : > { %v2318_v16 = vpop.eup %2317 }
 0x840   : > { %v2320_v21 = vpop.eup %2319  ;;  %v884_v18 = vmul.f32 %v2318_v16, %v2933_v20 }
 0x841   : > { %v885_v4 = vmul.f32 %v2320_v21, %v2937_v25 }
 0x843   : > { %v2322_v29 = vpop.eup %2321 }
 0x844   : > { %v2324_v13 = vpop.eup %2323  ;;  %v886_v42 = vmul.f32 %v2322_v29, %v2931_v17 }
 0x845   : > { %v887_v6 = vmul.f32 %v2324_v13, %v2935_v23 }
 0x849   : > { %v2215_v2 = vpop.permute.xlu0 %2214 }
 0x84a   : > { %v2217_v22 = vunpack.i.h.bf16 %v2215_v2  ;;  %v2216_v26 = vunpack.i.l.bf16 %v2215_v2 }
 0x84c   : > { %v1668_v7 = vsel %vm658_vm2, %v884_v18, %v2216_v26  ;;  %v1669_v28 = vsel %vm658_vm2, %v885_v4, %v2217_v22 }
 0x84d   : > { %v2220_v0 = vpop.permute.xlu1 %2219 }
 0x84e   : > { %v2222_v32 = vunpack.i.h.bf16 %v2220_v0  ;;  %v2221_v34 = vunpack.i.l.bf16 %v2220_v0 }
 0x850   : > { %v1671_v61 = vsel %vm658_vm2, %v887_v6, %v2222_v32  ;;  %v1670_v12 = vsel %vm658_vm2, %v886_v42, %v2221_v34 }
 0x851   : > { %v2225_v11 = vpop.permute.xlu1 %2224 }
 0x852   : > { %v2227_v8 = vunpack.i.h.bf16 %v2225_v11  ;;  %v2226_v27 = vunpack.i.l.bf16 %v2225_v11 }
 0x854   : > { %v1673_v37 = vsel %vm753_vm3, %v1669_v28, %v2227_v8  ;;  %v1672_v20 = vsel %vm753_vm3, %v1668_v7, %v2226_v27 }
 0x855   : > { %v2230_v3 = vpop.permute.xlu1 %2229 }
 0x856   : > { %v2232_v25 = vunpack.i.h.bf16 %v2230_v3  ;;  %v2231_v38 = vunpack.i.l.bf16 %v2230_v3 }
 0x858   : > { %v1674_v30 = vsel %vm753_vm3, %v1670_v12, %v2231_v38  ;;  %v1675_v17 = vsel %vm753_vm3, %v1671_v61, %v2232_v25 }
 0x873   : > { %v1562_v9 = vpop.f32.mrb[36].mxu1 }
 0x874   : > { %v2094_v43 = vpop.f32.mrb[37].mxu1  ;;  %v1616_v39 = vmul.f32 %v2312_v54, %v1562_v9 }
 0x875   : > { %v1565_v45 = vpop.f32.mrb[38].mxu1 }
 0x876   : > { %v1617_v46 = vmul.f32 %v2310_v14, %v1565_v45  ;;  %v2095_v19 = vpop.f32.mrb[39].mxu1 }
 0x877   : > { %v1609_v58 = vpop.f32.mrb[40].mxu0 }
 0x878   : > { %v2233_v48 = vpack.i.bf16 %v1617_v46, %v1616_v39  ;;  %v2100_v56 = vpop.f32.mrb[41].mxu0  ;;  %v1618_v51 = vmul.f32 %v2314_v47, %v1609_v58 }
 0x879   : > { %v1612_v50 = vpop.f32.mrb[42].mxu0 }
 0x87a   : > { %v1619_v52 = vmul.f32 %v2316_v49, %v1612_v50  ;;  %v2101_v53 = vpop.f32.mrb[43].mxu0  ;;  %2234 = vrot.lane.b32.xlu0 %v2233_v48, %s2562_s1 }
 0x87c   : > { %v2238_v41 = vpack.i.bf16 %v1619_v52, %v1618_v51 }
 0x87e   : > { %2239 = vrot.lane.b32.xlu1 %v2238_v41, %s2562_s1  ;;  %s2473_s1 = scalar_lea.vmem %s2472_s20, 1024 }
 0x87f   : > { %p2475_p7 = scmp.lt.s32.totalorder %s2473_s1, %s2467_s19 }
 0x881   : > { %p2476_p9 = por %p2475_p7, %p2474_p3 }
 0x883   : > { %p2477_p12 = pnand %p2476_p9, %p2470_p13 }
 0x8ec   : > { %v2235_v31 = vpop.permute.xlu0 %2234 }
 0x8ed   : > { %v2237_v35 = vunpack.i.h.bf16 %v2235_v31  ;;  %v2236_v36 = vunpack.i.l.bf16 %v2235_v31 }
 0x8ef   : > { %v1678_v10 = vsel %vm1676_vm4, %v1673_v37, %v2237_v35  ;;  %v1677_v5 = vsel %vm1676_vm4, %v1672_v20, %v2236_v36 }
 0x8f0   : > { %v1681_v44 = vpack.c.bf16 %v1678_v10, %v1677_v5  ;;  %v2240_v55 = vpop.permute.xlu1 %2239 }
 0x8f1   : > { %v2242_v24 = vunpack.i.h.bf16 %v2240_v55  ;;  %v2241_v15 = vunpack.i.l.bf16 %v2240_v55 }
 0x8f2   : > { %2106 = vmatprep.mubr.msk.bf16.mxu1 %vm462_vm0, %v1681_v44 }
 0x8f3   : > { %v1679_v23 = vsel %vm1676_vm4, %v1674_v30, %v2241_v15  ;;  %v1680_v33 = vsel %vm1676_vm4, %v1675_v17, %v2242_v24 }
 0x8f4   : > { %v1682_v40 = vpack.c.bf16 %v1680_v33, %v1679_v23 }
 0x8f6   : > { %2107 = vmatmul.mubr.msk.bf16.vlgmr.msra.gmra.mrb[40].mxu1 %vm462_vm0, %v1682_v40 }
 0x9c9   : > { %v2108_v1 = vpop.f32.mrb[40].mxu1 }
 0x9ca   : > { %v1755_v9 = vadd.f32 %v2108_v1, %v1943_v63  ;;  %v1746_v14 = vpop.f32.mrb[41].mxu1 }
 0x9cb   : > { %v1747_v43 = vadd.f32 %v1943_v63, %v1746_v14  ;;  %v2109_v54 = vpop.f32.mrb[42].mxu1 }
 0x9cc   : > { %1763 = vst.msk [vmem:[%s353_s23 + $0x10] sm:$0xff] %vm462_vm0, %v1755_v9  ;;  %v1758_v45 = vadd.f32 %v2109_v54, %v1943_v63  ;;  %v1749_v39 = vpop.f32.mrb[43].mxu1 }
 0x9cd   : > { %1761 = vst.msk [vmem:[%s353_s23] sm:$0xff] %vm462_vm0, %v1747_v43  ;;  %v1750_v46 = vadd.f32 %v1943_v63, %v1749_v39 }
 0x9ce   : > { %1764 = vst.msk [vmem:[%s353_s23 + $0x18] sm:$0xff] %vm462_vm0, %v1758_v45 }
 0x9cf   : > { %1762 = vst.msk [vmem:[%s353_s23 + $0x8] sm:$0xff] %vm462_vm0, %v1750_v46 }
 0x9d0   : > { %2480 = shalt.err (!%p2477_p12)
}
 0x9d1   : > { %s2481_s18 = scalar_lea.hbm %s3110_s16, 512  ;;  %s2485_s23 = scalar_lea.hbm %s3163_s7, 2048 }
 0x9d2   : > { %p2482_p0 = scmp.ne.s32.totalorder %s3110_s16, %s2481_s18  ;;  %p2486_p11 = scmp.lt.u32.totalorder %s3110_s16, %s3163_s7 }
 0x9d3   : > { %p2487_p1 = scmp.lt.u32.totalorder %s2485_s23, %s2481_s18  ;;  %p2489_p4 = scmp.lt.u32.totalorder %s2481_s18, %s3110_s16 }
 0x9d4   : > { %p2483_p5 = pnand %p2482_p0, %p2769_p6 }
 0x9d5   : > { %p2488_p2 = por %p2487_p1, %p2486_p11 }
 0x9d6   : > { %p2484_p10 = pneg %p2483_p5 }
 0x9d7   : > { %p2490_p8 = por %p2489_p4, %p2488_p2 }
 0x9d9   : > { %p2491_p13 = pnand %p2490_p8, %p2484_p10 }
 0x9db   : > { %2494 = shalt.err (!%p2491_p13)
}
 0x9dc   : > { %s2564_s17 = smov 128  }
 0x9dd   : > { %2128 = dma.vmem_to_hbm [thread:$0]  (%p2769_p6), %s3104_s30, 512, %s3110_s16, %s1766_s28, %s2564_s17, %s2564_s17, %s2560_s15  }
 0x9de PF: > { %p2160_p3 = scmp.ge.s32.totalorder %s2541_s27, 2  ;;  %s1795_s19 = sand.u32 1, %s2529_s24  }
 0x9df   : > { %p3183_p7 = scmp.ne.s32.totalorder %s3169_s8, 0  ;;  %s1796_s14 = scalar_lea.sflag [#allocation4], %s1795_s19 }
 0x9e1   : > { %p2148_p9 = pnand %p2160_p3, %p3183_p7 }
 0x9e3   : > { %2524 = dma.done.wait (!%p2148_p9), %s1796_s14, 512  }
 0x9e4   : > { %2526 = vsyncadd (!%p2148_p9), %s1796_s14, 4294966784  ;;  %p22_p12 = scmp.ge.s32.totalorder %s2756_s12, 6   ;;  %s3184_s24 = smov %s2533_s25 }
 0x9e5   : > { %s3185_s25 = smov %s2537_s26  ;;  %s3186_s26 = smov %s2765_s21 }
 0x9e6   : > { %s3187_s27 = smov %s2756_s12  ;;  %24 = sbr.rel (!%p22_p12) target bundleno = 9 (0x9), region = 109 }
 0x9ed   :  { %1801 = vsyncpa [#allocation3], 1 }
 0x9ee   :  { %1803 = vsyncpa [#allocation3 + $0x1], 1 }
 0x9ef   :  { %1804 = vsyncpa [#allocation6], 1 }
 0x9f0   :  { %1805 = vsyncpa [#allocation9], 1 }
 0x9f1   :  { %1806 = vsyncpa [#allocation4], 1 }
 0x9f2   :  { %1808 = vsyncpa [#allocation4 + $0x1], 1 }

</bundles_post_ra>
